<compile_context>
chip_gen: v6e
topology: v6e:2x2x1
jax: 0.10.0
libtpu: 0.0.40
codegen_flags: <defaults>
</compile_context>

<pallas_src>
import jax
import jax.numpy as jnp
from jax.experimental import pallas as pl
from jax.experimental.pallas import tpu as pltpu


# ----------------------------------------------------------------------------
# Kernel: per (batch-block, row-tile)
#   s_ci = relu( sum_cg wg[ci,cg]*g[cg] + sum_cx wx[ci,cx]*x[cx] + bsum[ci] )
#   psi  = sigmoid( sum_ci wpsi[ci]*s_ci + bpsi )        (BN, TR, 128)
#   out  = x * psi                                       (BN, Cx, TR, 128)
# Weights/biases are scalars read from SMEM; all vector work is full-vreg VPU
# FMAs on (BN, TR, 128) slabs, hidden under the input/output DMA.
# ----------------------------------------------------------------------------
def attn_gate_kernel(g_ref, x_ref, wg_ref, wx_ref, bsum_ref, wpsi_ref,
                     bpsi_ref, o_ref):
    g = g_ref[...].astype(jnp.float32)        # (BN, Cg, TR, 128)
    x = x_ref[...].astype(jnp.float32)        # (BN, Cx, TR, 128)
    cg_n = g.shape[1]
    cx_n = x.shape[1]
    ci_n = wg_ref.shape[0]

    psi_logit = None
    for ci in range(ci_n):                    # Ci small & static -> fully unrolled
        # bias folded into the first scalar*vector FMA (no jnp.full broadcast)
        acc = wg_ref[ci, 0] * g[:, 0] + bsum_ref[ci]
        for cg in range(1, cg_n):
            acc = acc + wg_ref[ci, cg] * g[:, cg]
        for cx in range(cx_n):
            acc = acc + wx_ref[ci, cx] * x[:, cx]
        term = wpsi_ref[ci] * jnp.maximum(acc, 0.0)
        psi_logit = term if psi_logit is None else psi_logit + term
    z = psi_logit + bpsi_ref[0]

    # sigmoid(z) = 1/(1+exp(-z)): exp + approx reciprocal run on the EUP slot;
    # one Newton step restores ~f32 accuracy without a VALU divide.  Clip keeps
    # exp finite so the Newton step never sees inf*0.
    z = jnp.clip(z, -30.0, 30.0)
    denom = 1.0 + jnp.exp(-z)
    r = pl.reciprocal(denom, approx=True)
    psi = r * (2.0 - denom * r)               # (BN, TR, 128)

    o_ref[...] = (x * psi[:, None, :, :]).astype(o_ref.dtype)


def _pick_batch_block(n, per_image_bytes, target_bytes=1 << 20,
                      cap_bytes=4 << 20):
    """Images per grid step: reach ~1 MiB payload, stay under the VMEM cap,
    keep >= 2 grid steps (v7x has 2 TensorCores), and divide N exactly."""
    if n <= 1:
        return 1
    want_target = -(-target_bytes // max(per_image_bytes, 1))
    want_cap = max(1, cap_bytes // max(per_image_bytes, 1))
    want = min(n, want_target, want_cap)
    want = min(want, max(1, n // 2))          # >= 2 parallel grid steps
    bn = 1
    for d in range(1, int(want) + 1):
        if n % d == 0:
            bn = d
    return bn


def attention_gate_pallas(g_nchw, x_nchw, params, *, max_tile_rows=512):
    """g_nchw: (N, Cg, H, W), x_nchw: (N, Cx, H, W). Returns (N, Cx, H, W)."""
    wg, bg, wx, bx, wpsi, bpsi = params       # folded conv+BN: (Cin,Cout)/(1,Cout)
    N, Cg, H, W = g_nchw.shape
    _, Cx, _, _ = x_nchw.shape
    Ci = wg.shape[1]
    HW = H * W
    LANES = 128
    cdiv = lambda a, b: -(-a // b)
    itemsize = jnp.dtype(x_nchw.dtype).itemsize

    # ---- lane-dense layout: (N, C, H*W) viewed as (N, C, rows, 128) slabs ----
    R = cdiv(HW, LANES)

    # Per-step live payload budget (g in + x in + out); the pipeline
    # double-buffers it.  Budgeted for v7x (64 MiB physical / 32 MiB scoped
    # VMEM), not v5e/v6e's 128 MiB, so no vmem_limit_bytes override is needed.
    bytes_per_row = (Cg + 2 * Cx) * LANES * itemsize
    rows_budget = max(8, ((4 << 20) // bytes_per_row) // 8 * 8)
    max_rows = min(max_tile_rows, rows_budget)

    if R <= max_rows:
        tile_rows, num_rt = R, 1
    else:
        num_rt = cdiv(R, max_rows)
        tile_rows = cdiv(cdiv(R, num_rt), 8) * 8      # multiple of 8 sublanes
    r_pad = num_rt * tile_rows
    hw_pad = r_pad * LANES

    def to_slabs(a, c):
        a3 = a.reshape(N, c, HW)                      # free metadata reshape
        if hw_pad != HW:                              # pad once with zeros ->
            a3 = jnp.pad(a3, ((0, 0), (0, 0), (0, hw_pad - HW)))  # no masked tiles
        return a3.reshape(N, c, r_pad, LANES)

    g4 = to_slabs(g_nchw, Cg)
    x4 = to_slabs(x_nchw, Cx)

    # Block several images per step for small images (amortize grid overhead).
    bn = 1
    if num_rt == 1:
        bn = _pick_batch_block(N, bytes_per_row * tile_rows)
    grid = (N // bn, num_rt)                          # both axes "parallel"

    # Output-channel-major weights, tiny -> resident in SMEM for the whole call.
    wg_s = jnp.asarray(wg.T, jnp.float32)                     # (Ci, Cg)
    wx_s = jnp.asarray(wx.T, jnp.float32)                     # (Ci, Cx)
    bsum = jnp.asarray((bg + bx).reshape(Ci), jnp.float32)    # (Ci,)  bg+bx fused
    wpsi_s = jnp.asarray(wpsi.reshape(Ci), jnp.float32)       # (Ci,)
    bpsi_s = jnp.asarray(bpsi.reshape(1), jnp.float32)        # (1,)

    smem_spec = pl.BlockSpec(memory_space=pltpu.MemorySpace.SMEM)

    out4 = pl.pallas_call(
        attn_gate_kernel,
        out_shape=jax.ShapeDtypeStruct((N, Cx, r_pad, LANES), x_nchw.dtype),
        grid=grid,
        in_specs=[
            pl.BlockSpec((bn, Cg, tile_rows, LANES), lambda b, t: (b, 0, t, 0)),
            pl.BlockSpec((bn, Cx, tile_rows, LANES), lambda b, t: (b, 0, t, 0)),
            smem_spec,  # wg   (Ci, Cg)
            smem_spec,  # wx   (Ci, Cx)
            smem_spec,  # bsum (Ci,)
            smem_spec,  # wpsi (Ci,)
            smem_spec,  # bpsi (1,)
        ],
        out_specs=pl.BlockSpec((bn, Cx, tile_rows, LANES),
                               lambda b, t: (b, 0, t, 0)),
        compiler_params=pltpu.CompilerParams(
            dimension_semantics=("parallel", "parallel")),
    )(g4, x4, wg_s, wx_s, bsum, wpsi_s, bpsi_s)

    out3 = out4.reshape(N, Cx, hw_pad)
    if hw_pad != HW:
        out3 = out3[:, :, :HW]
    return out3.reshape(N, Cx, H, W)


# ----------------------------------------------------------------------------
# Deterministic parameter construction: Conv2d(1x1) + BatchNorm2d (eval mode)
# folded into a single (Cin, Cout) weight and (1, Cout) bias.
# TODO(synk): BatchNorm2d training-mode (batch statistics) is not modeled;
#             eval-mode folding matches the inference forward pass.
# ----------------------------------------------------------------------------
def make_folded_conv_bn(key, c_in, c_out, eps=1e-5):
    kw, kb, kg, kbe, km, kv = jax.random.split(key, 6)
    bound = 1.0 / jnp.sqrt(c_in)
    w = jax.random.uniform(kw, (c_out, c_in), jnp.float32, -bound, bound)
    b = jax.random.uniform(kb, (c_out,), jnp.float32, -bound, bound)
    gamma = 1.0 + 0.1 * jax.random.normal(kg, (c_out,), jnp.float32)
    beta = 0.1 * jax.random.normal(kbe, (c_out,), jnp.float32)
    mean = 0.1 * jax.random.normal(km, (c_out,), jnp.float32)
    var = jnp.abs(jax.random.normal(kv, (c_out,), jnp.float32)) + 0.5

    scale = gamma / jnp.sqrt(var + eps)              # (Cout,)
    w_folded = (w * scale[:, None]).T                # (Cin, Cout)
    b_folded = ((b - mean) * scale + beta)[None, :]  # (1, Cout)
    return w_folded, b_folded


def reference_jax(g_nchw, x_nchw, params):
    wg, bg, wx, bx, wpsi, bpsi = params
    N, Cg, H, W = g_nchw.shape
    _, Cx, _, _ = x_nchw.shape
    g_flat = jnp.transpose(g_nchw, (0, 2, 3, 1)).reshape(-1, Cg)
    x_flat = jnp.transpose(x_nchw, (0, 2, 3, 1)).reshape(-1, Cx)
    g1 = g_flat @ wg + bg
    x1 = x_flat @ wx + bx
    s = jnp.maximum(g1 + x1, 0.0)
    psi = jax.nn.sigmoid(s @ wpsi + bpsi)
    out = x_flat * psi
    return jnp.transpose(out.reshape(N, H, W, Cx), (0, 3, 1, 2))


if __name__ == "__main__":
    # Shapes consistent with AttentionGate(gate_channels=4, skip_channels=4,
    # inter_channels=8) on NCHW inputs.
    N, Cg, Cx, Ci = 2, 4, 4, 8

    key = jax.random.PRNGKey(0)
    kg_in, kx_in, k_wg, k_wx, k_psi = jax.random.split(key, 5)

    wg, bg = make_folded_conv_bn(k_wg, Cg, Ci)
    wx, bx = make_folded_conv_bn(k_wx, Cx, Ci)
    wpsi, bpsi = make_folded_conv_bn(k_psi, Ci, 1)
    params = (wg, bg, wx, bx, wpsi, bpsi)

    # 1) f32, H*W divisible by 128 (16x16): free reshape, no padding.
    g = jax.random.normal(kg_in, (N, Cg, 16, 16), jnp.float32)
    x = jax.random.normal(kx_in, (N, Cx, 16, 16), jnp.float32)
    out = jax.block_until_ready(attention_gate_pallas(g, x, params))
    ref = reference_jax(g, x, params)
    assert out.shape == (N, Cx, 16, 16)
    assert jnp.allclose(out, ref, atol=1e-3, rtol=1e-3), "f32 mismatch"

    # 2) f32, H*W NOT divisible by 128 (10x10): exercises the pad-once path.
    g2 = jax.random.normal(jax.random.PRNGKey(1), (N, Cg, 10, 10), jnp.float32)
    x2 = jax.random.normal(jax.random.PRNGKey(2), (N, Cx, 10, 10), jnp.float32)
    out2 = jax.block_until_ready(attention_gate_pallas(g2, x2, params))
    ref2 = reference_jax(g2, x2, params)
    assert jnp.allclose(out2, ref2, atol=1e-3, rtol=1e-3), "padded f32 mismatch"

    # 3) bf16 I/O (halved HBM traffic on v6e/v7x); compute stays f32 in-kernel.
    g_bf = g.astype(jnp.bfloat16)
    x_bf = x.astype(jnp.bfloat16)
    out_bf = jax.block_until_ready(attention_gate_pallas(g_bf, x_bf, params))
    ref_bf = reference_jax(g_bf.astype(jnp.float32),
                           x_bf.astype(jnp.float32), params)
    assert out_bf.dtype == jnp.bfloat16
    assert jnp.allclose(out_bf.astype(jnp.float32), ref_bf,
                        atol=3e-2, rtol=3e-2), "bf16 mismatch"

    print("KERNEL_OK")
</pallas_src>

<mosaic_0001>
module attributes {stable_mosaic.version = 11 : i64} {
  func.func @attn_gate_kernel(%arg0: i32, %arg1: i32, %arg2: memref<1x4x2x128xf32, #tpu.memory_space<vmem>>, %arg3: memref<1x4x2x128xf32, #tpu.memory_space<vmem>>, %arg4: memref<8x4xf32, #tpu.memory_space<smem>>, %arg5: memref<8x4xf32, #tpu.memory_space<smem>>, %arg6: memref<8xf32, #tpu.memory_space<smem>>, %arg7: memref<8xf32, #tpu.memory_space<smem>>, %arg8: memref<1xf32, #tpu.memory_space<smem>>, %arg9: memref<1x4x2x128xf32, #tpu.memory_space<vmem>>) attributes {dimension_semantics = [#tpu.dimension_semantics<parallel>, #tpu.dimension_semantics<parallel>], iteration_bounds = array<i64: 2, 1>, scalar_prefetch = 0 : i64, scratch_operands = 0 : i64, tpu.core_type = #tpu.core_type<tc>, window_params = [{transform_indices = @transform_0, window_bounds = array<i64: 1, 4, 2, 128>}, {transform_indices = @transform_1, window_bounds = array<i64: 1, 4, 2, 128>}, {transform_indices = @transform_2, window_bounds = array<i64: 8, 4>}, {transform_indices = @transform_3, window_bounds = array<i64: 8, 4>}, {transform_indices = @transform_4, window_bounds = array<i64: 8>}, {transform_indices = @transform_5, window_bounds = array<i64: 8>}, {transform_indices = @transform_6, window_bounds = array<i64: 1>}, {transform_indices = @transform_7, window_bounds = array<i64: 1, 4, 2, 128>}]} {
    %c0 = arith.constant 0 : index
    %c0_0 = arith.constant 0 : index
    %c0_1 = arith.constant 0 : index
    %c0_2 = arith.constant 0 : index
    %0 = vector.load %arg2[%c0, %c0_0, %c0_1, %c0_2] : memref<1x4x2x128xf32, #tpu.memory_space<vmem>>, vector<1x4x2x128xf32>
    %c0_3 = arith.constant 0 : index
    %c0_4 = arith.constant 0 : index
    %c0_5 = arith.constant 0 : index
    %c0_6 = arith.constant 0 : index
    %1 = vector.load %arg3[%c0_3, %c0_4, %c0_5, %c0_6] : memref<1x4x2x128xf32, #tpu.memory_space<vmem>>, vector<1x4x2x128xf32>
    %c0_7 = arith.constant 0 : index
    %c0_8 = arith.constant 0 : index
    %2 = memref.load %arg4[%c0_7, %c0_8] : memref<8x4xf32, #tpu.memory_space<smem>>
    %3 = vector.extract_strided_slice %0 {offsets = [0, 0, 0, 0], sizes = [1, 1, 2, 128], strides = [1, 1, 1, 1]} : vector<1x4x2x128xf32> to vector<1x1x2x128xf32>
    %4 = vector.shape_cast %3 : vector<1x1x2x128xf32> to vector<1x2x128xf32>
    %5 = vector.broadcast %2 : f32 to vector<1x2x128xf32>
    %6 = arith.mulf %5, %4 : vector<1x2x128xf32>
    %c0_9 = arith.constant 0 : index
    %7 = memref.load %arg6[%c0_9] : memref<8xf32, #tpu.memory_space<smem>>
    %8 = vector.broadcast %7 : f32 to vector<1x2x128xf32>
    %9 = arith.addf %6, %8 : vector<1x2x128xf32>
    %c0_10 = arith.constant 0 : index
    %c1 = arith.constant 1 : index
    %10 = memref.load %arg4[%c0_10, %c1] : memref<8x4xf32, #tpu.memory_space<smem>>
    %11 = vector.extract_strided_slice %0 {offsets = [0, 1, 0, 0], sizes = [1, 1, 2, 128], strides = [1, 1, 1, 1]} : vector<1x4x2x128xf32> to vector<1x1x2x128xf32>
    %12 = vector.shape_cast %11 : vector<1x1x2x128xf32> to vector<1x2x128xf32>
    %13 = vector.broadcast %10 : f32 to vector<1x2x128xf32>
    %14 = arith.mulf %13, %12 : vector<1x2x128xf32>
    %15 = arith.addf %9, %14 : vector<1x2x128xf32>
    %c0_11 = arith.constant 0 : index
    %c2 = arith.constant 2 : index
    %16 = memref.load %arg4[%c0_11, %c2] : memref<8x4xf32, #tpu.memory_space<smem>>
    %17 = vector.extract_strided_slice %0 {offsets = [0, 2, 0, 0], sizes = [1, 1, 2, 128], strides = [1, 1, 1, 1]} : vector<1x4x2x128xf32> to vector<1x1x2x128xf32>
    %18 = vector.shape_cast %17 : vector<1x1x2x128xf32> to vector<1x2x128xf32>
    %19 = vector.broadcast %16 : f32 to vector<1x2x128xf32>
    %20 = arith.mulf %19, %18 : vector<1x2x128xf32>
    %21 = arith.addf %15, %20 : vector<1x2x128xf32>
    %c0_12 = arith.constant 0 : index
    %c3 = arith.constant 3 : index
    %22 = memref.load %arg4[%c0_12, %c3] : memref<8x4xf32, #tpu.memory_space<smem>>
    %23 = vector.extract_strided_slice %0 {offsets = [0, 3, 0, 0], sizes = [1, 1, 2, 128], strides = [1, 1, 1, 1]} : vector<1x4x2x128xf32> to vector<1x1x2x128xf32>
    %24 = vector.shape_cast %23 : vector<1x1x2x128xf32> to vector<1x2x128xf32>
    %25 = vector.broadcast %22 : f32 to vector<1x2x128xf32>
    %26 = arith.mulf %25, %24 : vector<1x2x128xf32>
    %27 = arith.addf %21, %26 : vector<1x2x128xf32>
    %c0_13 = arith.constant 0 : index
    %c0_14 = arith.constant 0 : index
    %28 = memref.load %arg5[%c0_13, %c0_14] : memref<8x4xf32, #tpu.memory_space<smem>>
    %29 = vector.extract_strided_slice %1 {offsets = [0, 0, 0, 0], sizes = [1, 1, 2, 128], strides = [1, 1, 1, 1]} : vector<1x4x2x128xf32> to vector<1x1x2x128xf32>
    %30 = vector.shape_cast %29 : vector<1x1x2x128xf32> to vector<1x2x128xf32>
    %31 = vector.broadcast %28 : f32 to vector<1x2x128xf32>
    %32 = arith.mulf %31, %30 : vector<1x2x128xf32>
    %33 = arith.addf %27, %32 : vector<1x2x128xf32>
    %c0_15 = arith.constant 0 : index
    %c1_16 = arith.constant 1 : index
    %34 = memref.load %arg5[%c0_15, %c1_16] : memref<8x4xf32, #tpu.memory_space<smem>>
    %35 = vector.extract_strided_slice %1 {offsets = [0, 1, 0, 0], sizes = [1, 1, 2, 128], strides = [1, 1, 1, 1]} : vector<1x4x2x128xf32> to vector<1x1x2x128xf32>
    %36 = vector.shape_cast %35 : vector<1x1x2x128xf32> to vector<1x2x128xf32>
    %37 = vector.broadcast %34 : f32 to vector<1x2x128xf32>
    %38 = arith.mulf %37, %36 : vector<1x2x128xf32>
    %39 = arith.addf %33, %38 : vector<1x2x128xf32>
    %c0_17 = arith.constant 0 : index
    %c2_18 = arith.constant 2 : index
    %40 = memref.load %arg5[%c0_17, %c2_18] : memref<8x4xf32, #tpu.memory_space<smem>>
    %41 = vector.extract_strided_slice %1 {offsets = [0, 2, 0, 0], sizes = [1, 1, 2, 128], strides = [1, 1, 1, 1]} : vector<1x4x2x128xf32> to vector<1x1x2x128xf32>
    %42 = vector.shape_cast %41 : vector<1x1x2x128xf32> to vector<1x2x128xf32>
    %43 = vector.broadcast %40 : f32 to vector<1x2x128xf32>
    %44 = arith.mulf %43, %42 : vector<1x2x128xf32>
    %45 = arith.addf %39, %44 : vector<1x2x128xf32>
    %c0_19 = arith.constant 0 : index
    %c3_20 = arith.constant 3 : index
    %46 = memref.load %arg5[%c0_19, %c3_20] : memref<8x4xf32, #tpu.memory_space<smem>>
    %47 = vector.extract_strided_slice %1 {offsets = [0, 3, 0, 0], sizes = [1, 1, 2, 128], strides = [1, 1, 1, 1]} : vector<1x4x2x128xf32> to vector<1x1x2x128xf32>
    %48 = vector.shape_cast %47 : vector<1x1x2x128xf32> to vector<1x2x128xf32>
    %49 = vector.broadcast %46 : f32 to vector<1x2x128xf32>
    %50 = arith.mulf %49, %48 : vector<1x2x128xf32>
    %51 = arith.addf %45, %50 : vector<1x2x128xf32>
    %c0_21 = arith.constant 0 : index
    %52 = memref.load %arg7[%c0_21] : memref<8xf32, #tpu.memory_space<smem>>
    %cst = arith.constant 0.000000e+00 : f32
    %53 = vector.broadcast %cst : f32 to vector<1x2x128xf32>
    %54 = arith.maximumf %51, %53 : vector<1x2x128xf32>
    %55 = vector.broadcast %52 : f32 to vector<1x2x128xf32>
    %56 = arith.mulf %55, %54 : vector<1x2x128xf32>
    %c1_22 = arith.constant 1 : index
    %c0_23 = arith.constant 0 : index
    %57 = memref.load %arg4[%c1_22, %c0_23] : memref<8x4xf32, #tpu.memory_space<smem>>
    %58 = vector.extract_strided_slice %0 {offsets = [0, 0, 0, 0], sizes = [1, 1, 2, 128], strides = [1, 1, 1, 1]} : vector<1x4x2x128xf32> to vector<1x1x2x128xf32>
    %59 = vector.shape_cast %58 : vector<1x1x2x128xf32> to vector<1x2x128xf32>
    %60 = vector.broadcast %57 : f32 to vector<1x2x128xf32>
    %61 = arith.mulf %60, %59 : vector<1x2x128xf32>
    %c1_24 = arith.constant 1 : index
    %62 = memref.load %arg6[%c1_24] : memref<8xf32, #tpu.memory_space<smem>>
    %63 = vector.broadcast %62 : f32 to vector<1x2x128xf32>
    %64 = arith.addf %61, %63 : vector<1x2x128xf32>
    %c1_25 = arith.constant 1 : index
    %c1_26 = arith.constant 1 : index
    %65 = memref.load %arg4[%c1_25, %c1_26] : memref<8x4xf32, #tpu.memory_space<smem>>
    %66 = vector.extract_strided_slice %0 {offsets = [0, 1, 0, 0], sizes = [1, 1, 2, 128], strides = [1, 1, 1, 1]} : vector<1x4x2x128xf32> to vector<1x1x2x128xf32>
    %67 = vector.shape_cast %66 : vector<1x1x2x128xf32> to vector<1x2x128xf32>
    %68 = vector.broadcast %65 : f32 to vector<1x2x128xf32>
    %69 = arith.mulf %68, %67 : vector<1x2x128xf32>
    %70 = arith.addf %64, %69 : vector<1x2x128xf32>
    %c1_27 = arith.constant 1 : index
    %c2_28 = arith.constant 2 : index
    %71 = memref.load %arg4[%c1_27, %c2_28] : memref<8x4xf32, #tpu.memory_space<smem>>
    %72 = vector.extract_strided_slice %0 {offsets = [0, 2, 0, 0], sizes = [1, 1, 2, 128], strides = [1, 1, 1, 1]} : vector<1x4x2x128xf32> to vector<1x1x2x128xf32>
    %73 = vector.shape_cast %72 : vector<1x1x2x128xf32> to vector<1x2x128xf32>
    %74 = vector.broadcast %71 : f32 to vector<1x2x128xf32>
    %75 = arith.mulf %74, %73 : vector<1x2x128xf32>
    %76 = arith.addf %70, %75 : vector<1x2x128xf32>
    %c1_29 = arith.constant 1 : index
    %c3_30 = arith.constant 3 : index
    %77 = memref.load %arg4[%c1_29, %c3_30] : memref<8x4xf32, #tpu.memory_space<smem>>
    %78 = vector.extract_strided_slice %0 {offsets = [0, 3, 0, 0], sizes = [1, 1, 2, 128], strides = [1, 1, 1, 1]} : vector<1x4x2x128xf32> to vector<1x1x2x128xf32>
    %79 = vector.shape_cast %78 : vector<1x1x2x128xf32> to vector<1x2x128xf32>
    %80 = vector.broadcast %77 : f32 to vector<1x2x128xf32>
    %81 = arith.mulf %80, %79 : vector<1x2x128xf32>
    %82 = arith.addf %76, %81 : vector<1x2x128xf32>
    %c1_31 = arith.constant 1 : index
    %c0_32 = arith.constant 0 : index
    %83 = memref.load %arg5[%c1_31, %c0_32] : memref<8x4xf32, #tpu.memory_space<smem>>
    %84 = vector.extract_strided_slice %1 {offsets = [0, 0, 0, 0], sizes = [1, 1, 2, 128], strides = [1, 1, 1, 1]} : vector<1x4x2x128xf32> to vector<1x1x2x128xf32>
    %85 = vector.shape_cast %84 : vector<1x1x2x128xf32> to vector<1x2x128xf32>
    %86 = vector.broadcast %83 : f32 to vector<1x2x128xf32>
    %87 = arith.mulf %86, %85 : vector<1x2x128xf32>
    %88 = arith.addf %82, %87 : vector<1x2x128xf32>
    %c1_33 = arith.constant 1 : index
    %c1_34 = arith.constant 1 : index
    %89 = memref.load %arg5[%c1_33, %c1_34] : memref<8x4xf32, #tpu.memory_space<smem>>
    %90 = vector.extract_strided_slice %1 {offsets = [0, 1, 0, 0], sizes = [1, 1, 2, 128], strides = [1, 1, 1, 1]} : vector<1x4x2x128xf32> to vector<1x1x2x128xf32>
    %91 = vector.shape_cast %90 : vector<1x1x2x128xf32> to vector<1x2x128xf32>
    %92 = vector.broadcast %89 : f32 to vector<1x2x128xf32>
    %93 = arith.mulf %92, %91 : vector<1x2x128xf32>
    %94 = arith.addf %88, %93 : vector<1x2x128xf32>
    %c1_35 = arith.constant 1 : index
    %c2_36 = arith.constant 2 : index
    %95 = memref.load %arg5[%c1_35, %c2_36] : memref<8x4xf32, #tpu.memory_space<smem>>
    %96 = vector.extract_strided_slice %1 {offsets = [0, 2, 0, 0], sizes = [1, 1, 2, 128], strides = [1, 1, 1, 1]} : vector<1x4x2x128xf32> to vector<1x1x2x128xf32>
    %97 = vector.shape_cast %96 : vector<1x1x2x128xf32> to vector<1x2x128xf32>
    %98 = vector.broadcast %95 : f32 to vector<1x2x128xf32>
    %99 = arith.mulf %98, %97 : vector<1x2x128xf32>
    %100 = arith.addf %94, %99 : vector<1x2x128xf32>
    %c1_37 = arith.constant 1 : index
    %c3_38 = arith.constant 3 : index
    %101 = memref.load %arg5[%c1_37, %c3_38] : memref<8x4xf32, #tpu.memory_space<smem>>
    %102 = vector.extract_strided_slice %1 {offsets = [0, 3, 0, 0], sizes = [1, 1, 2, 128], strides = [1, 1, 1, 1]} : vector<1x4x2x128xf32> to vector<1x1x2x128xf32>
    %103 = vector.shape_cast %102 : vector<1x1x2x128xf32> to vector<1x2x128xf32>
    %104 = vector.broadcast %101 : f32 to vector<1x2x128xf32>
    %105 = arith.mulf %104, %103 : vector<1x2x128xf32>
    %106 = arith.addf %100, %105 : vector<1x2x128xf32>
    %c1_39 = arith.constant 1 : index
    %107 = memref.load %arg7[%c1_39] : memref<8xf32, #tpu.memory_space<smem>>
    %cst_40 = arith.constant 0.000000e+00 : f32
    %108 = vector.broadcast %cst_40 : f32 to vector<1x2x128xf32>
    %109 = arith.maximumf %106, %108 : vector<1x2x128xf32>
    %110 = vector.broadcast %107 : f32 to vector<1x2x128xf32>
    %111 = arith.mulf %110, %109 : vector<1x2x128xf32>
    %112 = arith.addf %56, %111 : vector<1x2x128xf32>
    %c2_41 = arith.constant 2 : index
    %c0_42 = arith.constant 0 : index
    %113 = memref.load %arg4[%c2_41, %c0_42] : memref<8x4xf32, #tpu.memory_space<smem>>
    %114 = vector.extract_strided_slice %0 {offsets = [0, 0, 0, 0], sizes = [1, 1, 2, 128], strides = [1, 1, 1, 1]} : vector<1x4x2x128xf32> to vector<1x1x2x128xf32>
    %115 = vector.shape_cast %114 : vector<1x1x2x128xf32> to vector<1x2x128xf32>
    %116 = vector.broadcast %113 : f32 to vector<1x2x128xf32>
    %117 = arith.mulf %116, %115 : vector<1x2x128xf32>
    %c2_43 = arith.constant 2 : index
    %118 = memref.load %arg6[%c2_43] : memref<8xf32, #tpu.memory_space<smem>>
    %119 = vector.broadcast %118 : f32 to vector<1x2x128xf32>
    %120 = arith.addf %117, %119 : vector<1x2x128xf32>
    %c2_44 = arith.constant 2 : index
    %c1_45 = arith.constant 1 : index
    %121 = memref.load %arg4[%c2_44, %c1_45] : memref<8x4xf32, #tpu.memory_space<smem>>
    %122 = vector.extract_strided_slice %0 {offsets = [0, 1, 0, 0], sizes = [1, 1, 2, 128], strides = [1, 1, 1, 1]} : vector<1x4x2x128xf32> to vector<1x1x2x128xf32>
    %123 = vector.shape_cast %122 : vector<1x1x2x128xf32> to vector<1x2x128xf32>
    %124 = vector.broadcast %121 : f32 to vector<1x2x128xf32>
    %125 = arith.mulf %124, %123 : vector<1x2x128xf32>
    %126 = arith.addf %120, %125 : vector<1x2x128xf32>
    %c2_46 = arith.constant 2 : index
    %c2_47 = arith.constant 2 : index
    %127 = memref.load %arg4[%c2_46, %c2_47] : memref<8x4xf32, #tpu.memory_space<smem>>
    %128 = vector.extract_strided_slice %0 {offsets = [0, 2, 0, 0], sizes = [1, 1, 2, 128], strides = [1, 1, 1, 1]} : vector<1x4x2x128xf32> to vector<1x1x2x128xf32>
    %129 = vector.shape_cast %128 : vector<1x1x2x128xf32> to vector<1x2x128xf32>
    %130 = vector.broadcast %127 : f32 to vector<1x2x128xf32>
    %131 = arith.mulf %130, %129 : vector<1x2x128xf32>
    %132 = arith.addf %126, %131 : vector<1x2x128xf32>
    %c2_48 = arith.constant 2 : index
    %c3_49 = arith.constant 3 : index
    %133 = memref.load %arg4[%c2_48, %c3_49] : memref<8x4xf32, #tpu.memory_space<smem>>
    %134 = vector.extract_strided_slice %0 {offsets = [0, 3, 0, 0], sizes = [1, 1, 2, 128], strides = [1, 1, 1, 1]} : vector<1x4x2x128xf32> to vector<1x1x2x128xf32>
    %135 = vector.shape_cast %134 : vector<1x1x2x128xf32> to vector<1x2x128xf32>
    %136 = vector.broadcast %133 : f32 to vector<1x2x128xf32>
    %137 = arith.mulf %136, %135 : vector<1x2x128xf32>
    %138 = arith.addf %132, %137 : vector<1x2x128xf32>
    %c2_50 = arith.constant 2 : index
    %c0_51 = arith.constant 0 : index
    %139 = memref.load %arg5[%c2_50, %c0_51] : memref<8x4xf32, #tpu.memory_space<smem>>
    %140 = vector.extract_strided_slice %1 {offsets = [0, 0, 0, 0], sizes = [1, 1, 2, 128], strides = [1, 1, 1, 1]} : vector<1x4x2x128xf32> to vector<1x1x2x128xf32>
    %141 = vector.shape_cast %140 : vector<1x1x2x128xf32> to vector<1x2x128xf32>
    %142 = vector.broadcast %139 : f32 to vector<1x2x128xf32>
    %143 = arith.mulf %142, %141 : vector<1x2x128xf32>
    %144 = arith.addf %138, %143 : vector<1x2x128xf32>
    %c2_52 = arith.constant 2 : index
    %c1_53 = arith.constant 1 : index
    %145 = memref.load %arg5[%c2_52, %c1_53] : memref<8x4xf32, #tpu.memory_space<smem>>
    %146 = vector.extract_strided_slice %1 {offsets = [0, 1, 0, 0], sizes = [1, 1, 2, 128], strides = [1, 1, 1, 1]} : vector<1x4x2x128xf32> to vector<1x1x2x128xf32>
    %147 = vector.shape_cast %146 : vector<1x1x2x128xf32> to vector<1x2x128xf32>
    %148 = vector.broadcast %145 : f32 to vector<1x2x128xf32>
    %149 = arith.mulf %148, %147 : vector<1x2x128xf32>
    %150 = arith.addf %144, %149 : vector<1x2x128xf32>
    %c2_54 = arith.constant 2 : index
    %c2_55 = arith.constant 2 : index
    %151 = memref.load %arg5[%c2_54, %c2_55] : memref<8x4xf32, #tpu.memory_space<smem>>
    %152 = vector.extract_strided_slice %1 {offsets = [0, 2, 0, 0], sizes = [1, 1, 2, 128], strides = [1, 1, 1, 1]} : vector<1x4x2x128xf32> to vector<1x1x2x128xf32>
    %153 = vector.shape_cast %152 : vector<1x1x2x128xf32> to vector<1x2x128xf32>
    %154 = vector.broadcast %151 : f32 to vector<1x2x128xf32>
    %155 = arith.mulf %154, %153 : vector<1x2x128xf32>
    %156 = arith.addf %150, %155 : vector<1x2x128xf32>
    %c2_56 = arith.constant 2 : index
    %c3_57 = arith.constant 3 : index
    %157 = memref.load %arg5[%c2_56, %c3_57] : memref<8x4xf32, #tpu.memory_space<smem>>
    %158 = vector.extract_strided_slice %1 {offsets = [0, 3, 0, 0], sizes = [1, 1, 2, 128], strides = [1, 1, 1, 1]} : vector<1x4x2x128xf32> to vector<1x1x2x128xf32>
    %159 = vector.shape_cast %158 : vector<1x1x2x128xf32> to vector<1x2x128xf32>
    %160 = vector.broadcast %157 : f32 to vector<1x2x128xf32>
    %161 = arith.mulf %160, %159 : vector<1x2x128xf32>
    %162 = arith.addf %156, %161 : vector<1x2x128xf32>
    %c2_58 = arith.constant 2 : index
    %163 = memref.load %arg7[%c2_58] : memref<8xf32, #tpu.memory_space<smem>>
    %cst_59 = arith.constant 0.000000e+00 : f32
    %164 = vector.broadcast %cst_59 : f32 to vector<1x2x128xf32>
    %165 = arith.maximumf %162, %164 : vector<1x2x128xf32>
    %166 = vector.broadcast %163 : f32 to vector<1x2x128xf32>
    %167 = arith.mulf %166, %165 : vector<1x2x128xf32>
    %168 = arith.addf %112, %167 : vector<1x2x128xf32>
    %c3_60 = arith.constant 3 : index
    %c0_61 = arith.constant 0 : index
    %169 = memref.load %arg4[%c3_60, %c0_61] : memref<8x4xf32, #tpu.memory_space<smem>>
    %170 = vector.extract_strided_slice %0 {offsets = [0, 0, 0, 0], sizes = [1, 1, 2, 128], strides = [1, 1, 1, 1]} : vector<1x4x2x128xf32> to vector<1x1x2x128xf32>
    %171 = vector.shape_cast %170 : vector<1x1x2x128xf32> to vector<1x2x128xf32>
    %172 = vector.broadcast %169 : f32 to vector<1x2x128xf32>
    %173 = arith.mulf %172, %171 : vector<1x2x128xf32>
    %c3_62 = arith.constant 3 : index
    %174 = memref.load %arg6[%c3_62] : memref<8xf32, #tpu.memory_space<smem>>
    %175 = vector.broadcast %174 : f32 to vector<1x2x128xf32>
    %176 = arith.addf %173, %175 : vector<1x2x128xf32>
    %c3_63 = arith.constant 3 : index
    %c1_64 = arith.constant 1 : index
    %177 = memref.load %arg4[%c3_63, %c1_64] : memref<8x4xf32, #tpu.memory_space<smem>>
    %178 = vector.extract_strided_slice %0 {offsets = [0, 1, 0, 0], sizes = [1, 1, 2, 128], strides = [1, 1, 1, 1]} : vector<1x4x2x128xf32> to vector<1x1x2x128xf32>
    %179 = vector.shape_cast %178 : vector<1x1x2x128xf32> to vector<1x2x128xf32>
    %180 = vector.broadcast %177 : f32 to vector<1x2x128xf32>
    %181 = arith.mulf %180, %179 : vector<1x2x128xf32>
    %182 = arith.addf %176, %181 : vector<1x2x128xf32>
    %c3_65 = arith.constant 3 : index
    %c2_66 = arith.constant 2 : index
    %183 = memref.load %arg4[%c3_65, %c2_66] : memref<8x4xf32, #tpu.memory_space<smem>>
    %184 = vector.extract_strided_slice %0 {offsets = [0, 2, 0, 0], sizes = [1, 1, 2, 128], strides = [1, 1, 1, 1]} : vector<1x4x2x128xf32> to vector<1x1x2x128xf32>
    %185 = vector.shape_cast %184 : vector<1x1x2x128xf32> to vector<1x2x128xf32>
    %186 = vector.broadcast %183 : f32 to vector<1x2x128xf32>
    %187 = arith.mulf %186, %185 : vector<1x2x128xf32>
    %188 = arith.addf %182, %187 : vector<1x2x128xf32>
    %c3_67 = arith.constant 3 : index
    %c3_68 = arith.constant 3 : index
    %189 = memref.load %arg4[%c3_67, %c3_68] : memref<8x4xf32, #tpu.memory_space<smem>>
    %190 = vector.extract_strided_slice %0 {offsets = [0, 3, 0, 0], sizes = [1, 1, 2, 128], strides = [1, 1, 1, 1]} : vector<1x4x2x128xf32> to vector<1x1x2x128xf32>
    %191 = vector.shape_cast %190 : vector<1x1x2x128xf32> to vector<1x2x128xf32>
    %192 = vector.broadcast %189 : f32 to vector<1x2x128xf32>
    %193 = arith.mulf %192, %191 : vector<1x2x128xf32>
    %194 = arith.addf %188, %193 : vector<1x2x128xf32>
    %c3_69 = arith.constant 3 : index
    %c0_70 = arith.constant 0 : index
    %195 = memref.load %arg5[%c3_69, %c0_70] : memref<8x4xf32, #tpu.memory_space<smem>>
    %196 = vector.extract_strided_slice %1 {offsets = [0, 0, 0, 0], sizes = [1, 1, 2, 128], strides = [1, 1, 1, 1]} : vector<1x4x2x128xf32> to vector<1x1x2x128xf32>
    %197 = vector.shape_cast %196 : vector<1x1x2x128xf32> to vector<1x2x128xf32>
    %198 = vector.broadcast %195 : f32 to vector<1x2x128xf32>
    %199 = arith.mulf %198, %197 : vector<1x2x128xf32>
    %200 = arith.addf %194, %199 : vector<1x2x128xf32>
    %c3_71 = arith.constant 3 : index
    %c1_72 = arith.constant 1 : index
    %201 = memref.load %arg5[%c3_71, %c1_72] : memref<8x4xf32, #tpu.memory_space<smem>>
    %202 = vector.extract_strided_slice %1 {offsets = [0, 1, 0, 0], sizes = [1, 1, 2, 128], strides = [1, 1, 1, 1]} : vector<1x4x2x128xf32> to vector<1x1x2x128xf32>
    %203 = vector.shape_cast %202 : vector<1x1x2x128xf32> to vector<1x2x128xf32>
    %204 = vector.broadcast %201 : f32 to vector<1x2x128xf32>
    %205 = arith.mulf %204, %203 : vector<1x2x128xf32>
    %206 = arith.addf %200, %205 : vector<1x2x128xf32>
    %c3_73 = arith.constant 3 : index
    %c2_74 = arith.constant 2 : index
    %207 = memref.load %arg5[%c3_73, %c2_74] : memref<8x4xf32, #tpu.memory_space<smem>>
    %208 = vector.extract_strided_slice %1 {offsets = [0, 2, 0, 0], sizes = [1, 1, 2, 128], strides = [1, 1, 1, 1]} : vector<1x4x2x128xf32> to vector<1x1x2x128xf32>
    %209 = vector.shape_cast %208 : vector<1x1x2x128xf32> to vector<1x2x128xf32>
    %210 = vector.broadcast %207 : f32 to vector<1x2x128xf32>
    %211 = arith.mulf %210, %209 : vector<1x2x128xf32>
    %212 = arith.addf %206, %211 : vector<1x2x128xf32>
    %c3_75 = arith.constant 3 : index
    %c3_76 = arith.constant 3 : index
    %213 = memref.load %arg5[%c3_75, %c3_76] : memref<8x4xf32, #tpu.memory_space<smem>>
    %214 = vector.extract_strided_slice %1 {offsets = [0, 3, 0, 0], sizes = [1, 1, 2, 128], strides = [1, 1, 1, 1]} : vector<1x4x2x128xf32> to vector<1x1x2x128xf32>
    %215 = vector.shape_cast %214 : vector<1x1x2x128xf32> to vector<1x2x128xf32>
    %216 = vector.broadcast %213 : f32 to vector<1x2x128xf32>
    %217 = arith.mulf %216, %215 : vector<1x2x128xf32>
    %218 = arith.addf %212, %217 : vector<1x2x128xf32>
    %c3_77 = arith.constant 3 : index
    %219 = memref.load %arg7[%c3_77] : memref<8xf32, #tpu.memory_space<smem>>
    %cst_78 = arith.constant 0.000000e+00 : f32
    %220 = vector.broadcast %cst_78 : f32 to vector<1x2x128xf32>
    %221 = arith.maximumf %218, %220 : vector<1x2x128xf32>
    %222 = vector.broadcast %219 : f32 to vector<1x2x128xf32>
    %223 = arith.mulf %222, %221 : vector<1x2x128xf32>
    %224 = arith.addf %168, %223 : vector<1x2x128xf32>
    %c4 = arith.constant 4 : index
    %c0_79 = arith.constant 0 : index
    %225 = memref.load %arg4[%c4, %c0_79] : memref<8x4xf32, #tpu.memory_space<smem>>
    %226 = vector.extract_strided_slice %0 {offsets = [0, 0, 0, 0], sizes = [1, 1, 2, 128], strides = [1, 1, 1, 1]} : vector<1x4x2x128xf32> to vector<1x1x2x128xf32>
    %227 = vector.shape_cast %226 : vector<1x1x2x128xf32> to vector<1x2x128xf32>
    %228 = vector.broadcast %225 : f32 to vector<1x2x128xf32>
    %229 = arith.mulf %228, %227 : vector<1x2x128xf32>
    %c4_80 = arith.constant 4 : index
    %230 = memref.load %arg6[%c4_80] : memref<8xf32, #tpu.memory_space<smem>>
    %231 = vector.broadcast %230 : f32 to vector<1x2x128xf32>
    %232 = arith.addf %229, %231 : vector<1x2x128xf32>
    %c4_81 = arith.constant 4 : index
    %c1_82 = arith.constant 1 : index
    %233 = memref.load %arg4[%c4_81, %c1_82] : memref<8x4xf32, #tpu.memory_space<smem>>
    %234 = vector.extract_strided_slice %0 {offsets = [0, 1, 0, 0], sizes = [1, 1, 2, 128], strides = [1, 1, 1, 1]} : vector<1x4x2x128xf32> to vector<1x1x2x128xf32>
    %235 = vector.shape_cast %234 : vector<1x1x2x128xf32> to vector<1x2x128xf32>
    %236 = vector.broadcast %233 : f32 to vector<1x2x128xf32>
    %237 = arith.mulf %236, %235 : vector<1x2x128xf32>
    %238 = arith.addf %232, %237 : vector<1x2x128xf32>
    %c4_83 = arith.constant 4 : index
    %c2_84 = arith.constant 2 : index
    %239 = memref.load %arg4[%c4_83, %c2_84] : memref<8x4xf32, #tpu.memory_space<smem>>
    %240 = vector.extract_strided_slice %0 {offsets = [0, 2, 0, 0], sizes = [1, 1, 2, 128], strides = [1, 1, 1, 1]} : vector<1x4x2x128xf32> to vector<1x1x2x128xf32>
    %241 = vector.shape_cast %240 : vector<1x1x2x128xf32> to vector<1x2x128xf32>
    %242 = vector.broadcast %239 : f32 to vector<1x2x128xf32>
    %243 = arith.mulf %242, %241 : vector<1x2x128xf32>
    %244 = arith.addf %238, %243 : vector<1x2x128xf32>
    %c4_85 = arith.constant 4 : index
    %c3_86 = arith.constant 3 : index
    %245 = memref.load %arg4[%c4_85, %c3_86] : memref<8x4xf32, #tpu.memory_space<smem>>
    %246 = vector.extract_strided_slice %0 {offsets = [0, 3, 0, 0], sizes = [1, 1, 2, 128], strides = [1, 1, 1, 1]} : vector<1x4x2x128xf32> to vector<1x1x2x128xf32>
    %247 = vector.shape_cast %246 : vector<1x1x2x128xf32> to vector<1x2x128xf32>
    %248 = vector.broadcast %245 : f32 to vector<1x2x128xf32>
    %249 = arith.mulf %248, %247 : vector<1x2x128xf32>
    %250 = arith.addf %244, %249 : vector<1x2x128xf32>
    %c4_87 = arith.constant 4 : index
    %c0_88 = arith.constant 0 : index
    %251 = memref.load %arg5[%c4_87, %c0_88] : memref<8x4xf32, #tpu.memory_space<smem>>
    %252 = vector.extract_strided_slice %1 {offsets = [0, 0, 0, 0], sizes = [1, 1, 2, 128], strides = [1, 1, 1, 1]} : vector<1x4x2x128xf32> to vector<1x1x2x128xf32>
    %253 = vector.shape_cast %252 : vector<1x1x2x128xf32> to vector<1x2x128xf32>
    %254 = vector.broadcast %251 : f32 to vector<1x2x128xf32>
    %255 = arith.mulf %254, %253 : vector<1x2x128xf32>
    %256 = arith.addf %250, %255 : vector<1x2x128xf32>
    %c4_89 = arith.constant 4 : index
    %c1_90 = arith.constant 1 : index
    %257 = memref.load %arg5[%c4_89, %c1_90] : memref<8x4xf32, #tpu.memory_space<smem>>
    %258 = vector.extract_strided_slice %1 {offsets = [0, 1, 0, 0], sizes = [1, 1, 2, 128], strides = [1, 1, 1, 1]} : vector<1x4x2x128xf32> to vector<1x1x2x128xf32>
    %259 = vector.shape_cast %258 : vector<1x1x2x128xf32> to vector<1x2x128xf32>
    %260 = vector.broadcast %257 : f32 to vector<1x2x128xf32>
    %261 = arith.mulf %260, %259 : vector<1x2x128xf32>
    %262 = arith.addf %256, %261 : vector<1x2x128xf32>
    %c4_91 = arith.constant 4 : index
    %c2_92 = arith.constant 2 : index
    %263 = memref.load %arg5[%c4_91, %c2_92] : memref<8x4xf32, #tpu.memory_space<smem>>
    %264 = vector.extract_strided_slice %1 {offsets = [0, 2, 0, 0], sizes = [1, 1, 2, 128], strides = [1, 1, 1, 1]} : vector<1x4x2x128xf32> to vector<1x1x2x128xf32>
    %265 = vector.shape_cast %264 : vector<1x1x2x128xf32> to vector<1x2x128xf32>
    %266 = vector.broadcast %263 : f32 to vector<1x2x128xf32>
    %267 = arith.mulf %266, %265 : vector<1x2x128xf32>
    %268 = arith.addf %262, %267 : vector<1x2x128xf32>
    %c4_93 = arith.constant 4 : index
    %c3_94 = arith.constant 3 : index
    %269 = memref.load %arg5[%c4_93, %c3_94] : memref<8x4xf32, #tpu.memory_space<smem>>
    %270 = vector.extract_strided_slice %1 {offsets = [0, 3, 0, 0], sizes = [1, 1, 2, 128], strides = [1, 1, 1, 1]} : vector<1x4x2x128xf32> to vector<1x1x2x128xf32>
    %271 = vector.shape_cast %270 : vector<1x1x2x128xf32> to vector<1x2x128xf32>
    %272 = vector.broadcast %269 : f32 to vector<1x2x128xf32>
    %273 = arith.mulf %272, %271 : vector<1x2x128xf32>
    %274 = arith.addf %268, %273 : vector<1x2x128xf32>
    %c4_95 = arith.constant 4 : index
    %275 = memref.load %arg7[%c4_95] : memref<8xf32, #tpu.memory_space<smem>>
    %cst_96 = arith.constant 0.000000e+00 : f32
    %276 = vector.broadcast %cst_96 : f32 to vector<1x2x128xf32>
    %277 = arith.maximumf %274, %276 : vector<1x2x128xf32>
    %278 = vector.broadcast %275 : f32 to vector<1x2x128xf32>
    %279 = arith.mulf %278, %277 : vector<1x2x128xf32>
    %280 = arith.addf %224, %279 : vector<1x2x128xf32>
    %c5 = arith.constant 5 : index
    %c0_97 = arith.constant 0 : index
    %281 = memref.load %arg4[%c5, %c0_97] : memref<8x4xf32, #tpu.memory_space<smem>>
    %282 = vector.extract_strided_slice %0 {offsets = [0, 0, 0, 0], sizes = [1, 1, 2, 128], strides = [1, 1, 1, 1]} : vector<1x4x2x128xf32> to vector<1x1x2x128xf32>
    %283 = vector.shape_cast %282 : vector<1x1x2x128xf32> to vector<1x2x128xf32>
    %284 = vector.broadcast %281 : f32 to vector<1x2x128xf32>
    %285 = arith.mulf %284, %283 : vector<1x2x128xf32>
    %c5_98 = arith.constant 5 : index
    %286 = memref.load %arg6[%c5_98] : memref<8xf32, #tpu.memory_space<smem>>
    %287 = vector.broadcast %286 : f32 to vector<1x2x128xf32>
    %288 = arith.addf %285, %287 : vector<1x2x128xf32>
    %c5_99 = arith.constant 5 : index
    %c1_100 = arith.constant 1 : index
    %289 = memref.load %arg4[%c5_99, %c1_100] : memref<8x4xf32, #tpu.memory_space<smem>>
    %290 = vector.extract_strided_slice %0 {offsets = [0, 1, 0, 0], sizes = [1, 1, 2, 128], strides = [1, 1, 1, 1]} : vector<1x4x2x128xf32> to vector<1x1x2x128xf32>
    %291 = vector.shape_cast %290 : vector<1x1x2x128xf32> to vector<1x2x128xf32>
    %292 = vector.broadcast %289 : f32 to vector<1x2x128xf32>
    %293 = arith.mulf %292, %291 : vector<1x2x128xf32>
    %294 = arith.addf %288, %293 : vector<1x2x128xf32>
    %c5_101 = arith.constant 5 : index
    %c2_102 = arith.constant 2 : index
    %295 = memref.load %arg4[%c5_101, %c2_102] : memref<8x4xf32, #tpu.memory_space<smem>>
    %296 = vector.extract_strided_slice %0 {offsets = [0, 2, 0, 0], sizes = [1, 1, 2, 128], strides = [1, 1, 1, 1]} : vector<1x4x2x128xf32> to vector<1x1x2x128xf32>
    %297 = vector.shape_cast %296 : vector<1x1x2x128xf32> to vector<1x2x128xf32>
    %298 = vector.broadcast %295 : f32 to vector<1x2x128xf32>
    %299 = arith.mulf %298, %297 : vector<1x2x128xf32>
    %300 = arith.addf %294, %299 : vector<1x2x128xf32>
    %c5_103 = arith.constant 5 : index
    %c3_104 = arith.constant 3 : index
    %301 = memref.load %arg4[%c5_103, %c3_104] : memref<8x4xf32, #tpu.memory_space<smem>>
    %302 = vector.extract_strided_slice %0 {offsets = [0, 3, 0, 0], sizes = [1, 1, 2, 128], strides = [1, 1, 1, 1]} : vector<1x4x2x128xf32> to vector<1x1x2x128xf32>
    %303 = vector.shape_cast %302 : vector<1x1x2x128xf32> to vector<1x2x128xf32>
    %304 = vector.broadcast %301 : f32 to vector<1x2x128xf32>
    %305 = arith.mulf %304, %303 : vector<1x2x128xf32>
    %306 = arith.addf %300, %305 : vector<1x2x128xf32>
    %c5_105 = arith.constant 5 : index
    %c0_106 = arith.constant 0 : index
    %307 = memref.load %arg5[%c5_105, %c0_106] : memref<8x4xf32, #tpu.memory_space<smem>>
    %308 = vector.extract_strided_slice %1 {offsets = [0, 0, 0, 0], sizes = [1, 1, 2, 128], strides = [1, 1, 1, 1]} : vector<1x4x2x128xf32> to vector<1x1x2x128xf32>
    %309 = vector.shape_cast %308 : vector<1x1x2x128xf32> to vector<1x2x128xf32>
    %310 = vector.broadcast %307 : f32 to vector<1x2x128xf32>
    %311 = arith.mulf %310, %309 : vector<1x2x128xf32>
    %312 = arith.addf %306, %311 : vector<1x2x128xf32>
    %c5_107 = arith.constant 5 : index
    %c1_108 = arith.constant 1 : index
    %313 = memref.load %arg5[%c5_107, %c1_108] : memref<8x4xf32, #tpu.memory_space<smem>>
    %314 = vector.extract_strided_slice %1 {offsets = [0, 1, 0, 0], sizes = [1, 1, 2, 128], strides = [1, 1, 1, 1]} : vector<1x4x2x128xf32> to vector<1x1x2x128xf32>
    %315 = vector.shape_cast %314 : vector<1x1x2x128xf32> to vector<1x2x128xf32>
    %316 = vector.broadcast %313 : f32 to vector<1x2x128xf32>
    %317 = arith.mulf %316, %315 : vector<1x2x128xf32>
    %318 = arith.addf %312, %317 : vector<1x2x128xf32>
    %c5_109 = arith.constant 5 : index
    %c2_110 = arith.constant 2 : index
    %319 = memref.load %arg5[%c5_109, %c2_110] : memref<8x4xf32, #tpu.memory_space<smem>>
    %320 = vector.extract_strided_slice %1 {offsets = [0, 2, 0, 0], sizes = [1, 1, 2, 128], strides = [1, 1, 1, 1]} : vector<1x4x2x128xf32> to vector<1x1x2x128xf32>
    %321 = vector.shape_cast %320 : vector<1x1x2x128xf32> to vector<1x2x128xf32>
    %322 = vector.broadcast %319 : f32 to vector<1x2x128xf32>
    %323 = arith.mulf %322, %321 : vector<1x2x128xf32>
    %324 = arith.addf %318, %323 : vector<1x2x128xf32>
    %c5_111 = arith.constant 5 : index
    %c3_112 = arith.constant 3 : index
    %325 = memref.load %arg5[%c5_111, %c3_112] : memref<8x4xf32, #tpu.memory_space<smem>>
    %326 = vector.extract_strided_slice %1 {offsets = [0, 3, 0, 0], sizes = [1, 1, 2, 128], strides = [1, 1, 1, 1]} : vector<1x4x2x128xf32> to vector<1x1x2x128xf32>
    %327 = vector.shape_cast %326 : vector<1x1x2x128xf32> to vector<1x2x128xf32>
    %328 = vector.broadcast %325 : f32 to vector<1x2x128xf32>
    %329 = arith.mulf %328, %327 : vector<1x2x128xf32>
    %330 = arith.addf %324, %329 : vector<1x2x128xf32>
    %c5_113 = arith.constant 5 : index
    %331 = memref.load %arg7[%c5_113] : memref<8xf32, #tpu.memory_space<smem>>
    %cst_114 = arith.constant 0.000000e+00 : f32
    %332 = vector.broadcast %cst_114 : f32 to vector<1x2x128xf32>
    %333 = arith.maximumf %330, %332 : vector<1x2x128xf32>
    %334 = vector.broadcast %331 : f32 to vector<1x2x128xf32>
    %335 = arith.mulf %334, %333 : vector<1x2x128xf32>
    %336 = arith.addf %280, %335 : vector<1x2x128xf32>
    %c6 = arith.constant 6 : index
    %c0_115 = arith.constant 0 : index
    %337 = memref.load %arg4[%c6, %c0_115] : memref<8x4xf32, #tpu.memory_space<smem>>
    %338 = vector.extract_strided_slice %0 {offsets = [0, 0, 0, 0], sizes = [1, 1, 2, 128], strides = [1, 1, 1, 1]} : vector<1x4x2x128xf32> to vector<1x1x2x128xf32>
    %339 = vector.shape_cast %338 : vector<1x1x2x128xf32> to vector<1x2x128xf32>
    %340 = vector.broadcast %337 : f32 to vector<1x2x128xf32>
    %341 = arith.mulf %340, %339 : vector<1x2x128xf32>
    %c6_116 = arith.constant 6 : index
    %342 = memref.load %arg6[%c6_116] : memref<8xf32, #tpu.memory_space<smem>>
    %343 = vector.broadcast %342 : f32 to vector<1x2x128xf32>
    %344 = arith.addf %341, %343 : vector<1x2x128xf32>
    %c6_117 = arith.constant 6 : index
    %c1_118 = arith.constant 1 : index
    %345 = memref.load %arg4[%c6_117, %c1_118] : memref<8x4xf32, #tpu.memory_space<smem>>
    %346 = vector.extract_strided_slice %0 {offsets = [0, 1, 0, 0], sizes = [1, 1, 2, 128], strides = [1, 1, 1, 1]} : vector<1x4x2x128xf32> to vector<1x1x2x128xf32>
    %347 = vector.shape_cast %346 : vector<1x1x2x128xf32> to vector<1x2x128xf32>
    %348 = vector.broadcast %345 : f32 to vector<1x2x128xf32>
    %349 = arith.mulf %348, %347 : vector<1x2x128xf32>
    %350 = arith.addf %344, %349 : vector<1x2x128xf32>
    %c6_119 = arith.constant 6 : index
    %c2_120 = arith.constant 2 : index
    %351 = memref.load %arg4[%c6_119, %c2_120] : memref<8x4xf32, #tpu.memory_space<smem>>
    %352 = vector.extract_strided_slice %0 {offsets = [0, 2, 0, 0], sizes = [1, 1, 2, 128], strides = [1, 1, 1, 1]} : vector<1x4x2x128xf32> to vector<1x1x2x128xf32>
    %353 = vector.shape_cast %352 : vector<1x1x2x128xf32> to vector<1x2x128xf32>
    %354 = vector.broadcast %351 : f32 to vector<1x2x128xf32>
    %355 = arith.mulf %354, %353 : vector<1x2x128xf32>
    %356 = arith.addf %350, %355 : vector<1x2x128xf32>
    %c6_121 = arith.constant 6 : index
    %c3_122 = arith.constant 3 : index
    %357 = memref.load %arg4[%c6_121, %c3_122] : memref<8x4xf32, #tpu.memory_space<smem>>
    %358 = vector.extract_strided_slice %0 {offsets = [0, 3, 0, 0], sizes = [1, 1, 2, 128], strides = [1, 1, 1, 1]} : vector<1x4x2x128xf32> to vector<1x1x2x128xf32>
    %359 = vector.shape_cast %358 : vector<1x1x2x128xf32> to vector<1x2x128xf32>
    %360 = vector.broadcast %357 : f32 to vector<1x2x128xf32>
    %361 = arith.mulf %360, %359 : vector<1x2x128xf32>
    %362 = arith.addf %356, %361 : vector<1x2x128xf32>
    %c6_123 = arith.constant 6 : index
    %c0_124 = arith.constant 0 : index
    %363 = memref.load %arg5[%c6_123, %c0_124] : memref<8x4xf32, #tpu.memory_space<smem>>
    %364 = vector.extract_strided_slice %1 {offsets = [0, 0, 0, 0], sizes = [1, 1, 2, 128], strides = [1, 1, 1, 1]} : vector<1x4x2x128xf32> to vector<1x1x2x128xf32>
    %365 = vector.shape_cast %364 : vector<1x1x2x128xf32> to vector<1x2x128xf32>
    %366 = vector.broadcast %363 : f32 to vector<1x2x128xf32>
    %367 = arith.mulf %366, %365 : vector<1x2x128xf32>
    %368 = arith.addf %362, %367 : vector<1x2x128xf32>
    %c6_125 = arith.constant 6 : index
    %c1_126 = arith.constant 1 : index
    %369 = memref.load %arg5[%c6_125, %c1_126] : memref<8x4xf32, #tpu.memory_space<smem>>
    %370 = vector.extract_strided_slice %1 {offsets = [0, 1, 0, 0], sizes = [1, 1, 2, 128], strides = [1, 1, 1, 1]} : vector<1x4x2x128xf32> to vector<1x1x2x128xf32>
    %371 = vector.shape_cast %370 : vector<1x1x2x128xf32> to vector<1x2x128xf32>
    %372 = vector.broadcast %369 : f32 to vector<1x2x128xf32>
    %373 = arith.mulf %372, %371 : vector<1x2x128xf32>
    %374 = arith.addf %368, %373 : vector<1x2x128xf32>
    %c6_127 = arith.constant 6 : index
    %c2_128 = arith.constant 2 : index
    %375 = memref.load %arg5[%c6_127, %c2_128] : memref<8x4xf32, #tpu.memory_space<smem>>
    %376 = vector.extract_strided_slice %1 {offsets = [0, 2, 0, 0], sizes = [1, 1, 2, 128], strides = [1, 1, 1, 1]} : vector<1x4x2x128xf32> to vector<1x1x2x128xf32>
    %377 = vector.shape_cast %376 : vector<1x1x2x128xf32> to vector<1x2x128xf32>
    %378 = vector.broadcast %375 : f32 to vector<1x2x128xf32>
    %379 = arith.mulf %378, %377 : vector<1x2x128xf32>
    %380 = arith.addf %374, %379 : vector<1x2x128xf32>
    %c6_129 = arith.constant 6 : index
    %c3_130 = arith.constant 3 : index
    %381 = memref.load %arg5[%c6_129, %c3_130] : memref<8x4xf32, #tpu.memory_space<smem>>
    %382 = vector.extract_strided_slice %1 {offsets = [0, 3, 0, 0], sizes = [1, 1, 2, 128], strides = [1, 1, 1, 1]} : vector<1x4x2x128xf32> to vector<1x1x2x128xf32>
    %383 = vector.shape_cast %382 : vector<1x1x2x128xf32> to vector<1x2x128xf32>
    %384 = vector.broadcast %381 : f32 to vector<1x2x128xf32>
    %385 = arith.mulf %384, %383 : vector<1x2x128xf32>
    %386 = arith.addf %380, %385 : vector<1x2x128xf32>
    %c6_131 = arith.constant 6 : index
    %387 = memref.load %arg7[%c6_131] : memref<8xf32, #tpu.memory_space<smem>>
    %cst_132 = arith.constant 0.000000e+00 : f32
    %388 = vector.broadcast %cst_132 : f32 to vector<1x2x128xf32>
    %389 = arith.maximumf %386, %388 : vector<1x2x128xf32>
    %390 = vector.broadcast %387 : f32 to vector<1x2x128xf32>
    %391 = arith.mulf %390, %389 : vector<1x2x128xf32>
    %392 = arith.addf %336, %391 : vector<1x2x128xf32>
    %c7 = arith.constant 7 : index
    %c0_133 = arith.constant 0 : index
    %393 = memref.load %arg4[%c7, %c0_133] : memref<8x4xf32, #tpu.memory_space<smem>>
    %394 = vector.extract_strided_slice %0 {offsets = [0, 0, 0, 0], sizes = [1, 1, 2, 128], strides = [1, 1, 1, 1]} : vector<1x4x2x128xf32> to vector<1x1x2x128xf32>
    %395 = vector.shape_cast %394 : vector<1x1x2x128xf32> to vector<1x2x128xf32>
    %396 = vector.broadcast %393 : f32 to vector<1x2x128xf32>
    %397 = arith.mulf %396, %395 : vector<1x2x128xf32>
    %c7_134 = arith.constant 7 : index
    %398 = memref.load %arg6[%c7_134] : memref<8xf32, #tpu.memory_space<smem>>
    %399 = vector.broadcast %398 : f32 to vector<1x2x128xf32>
    %400 = arith.addf %397, %399 : vector<1x2x128xf32>
    %c7_135 = arith.constant 7 : index
    %c1_136 = arith.constant 1 : index
    %401 = memref.load %arg4[%c7_135, %c1_136] : memref<8x4xf32, #tpu.memory_space<smem>>
    %402 = vector.extract_strided_slice %0 {offsets = [0, 1, 0, 0], sizes = [1, 1, 2, 128], strides = [1, 1, 1, 1]} : vector<1x4x2x128xf32> to vector<1x1x2x128xf32>
    %403 = vector.shape_cast %402 : vector<1x1x2x128xf32> to vector<1x2x128xf32>
    %404 = vector.broadcast %401 : f32 to vector<1x2x128xf32>
    %405 = arith.mulf %404, %403 : vector<1x2x128xf32>
    %406 = arith.addf %400, %405 : vector<1x2x128xf32>
    %c7_137 = arith.constant 7 : index
    %c2_138 = arith.constant 2 : index
    %407 = memref.load %arg4[%c7_137, %c2_138] : memref<8x4xf32, #tpu.memory_space<smem>>
    %408 = vector.extract_strided_slice %0 {offsets = [0, 2, 0, 0], sizes = [1, 1, 2, 128], strides = [1, 1, 1, 1]} : vector<1x4x2x128xf32> to vector<1x1x2x128xf32>
    %409 = vector.shape_cast %408 : vector<1x1x2x128xf32> to vector<1x2x128xf32>
    %410 = vector.broadcast %407 : f32 to vector<1x2x128xf32>
    %411 = arith.mulf %410, %409 : vector<1x2x128xf32>
    %412 = arith.addf %406, %411 : vector<1x2x128xf32>
    %c7_139 = arith.constant 7 : index
    %c3_140 = arith.constant 3 : index
    %413 = memref.load %arg4[%c7_139, %c3_140] : memref<8x4xf32, #tpu.memory_space<smem>>
    %414 = vector.extract_strided_slice %0 {offsets = [0, 3, 0, 0], sizes = [1, 1, 2, 128], strides = [1, 1, 1, 1]} : vector<1x4x2x128xf32> to vector<1x1x2x128xf32>
    %415 = vector.shape_cast %414 : vector<1x1x2x128xf32> to vector<1x2x128xf32>
    %416 = vector.broadcast %413 : f32 to vector<1x2x128xf32>
    %417 = arith.mulf %416, %415 : vector<1x2x128xf32>
    %418 = arith.addf %412, %417 : vector<1x2x128xf32>
    %c7_141 = arith.constant 7 : index
    %c0_142 = arith.constant 0 : index
    %419 = memref.load %arg5[%c7_141, %c0_142] : memref<8x4xf32, #tpu.memory_space<smem>>
    %420 = vector.extract_strided_slice %1 {offsets = [0, 0, 0, 0], sizes = [1, 1, 2, 128], strides = [1, 1, 1, 1]} : vector<1x4x2x128xf32> to vector<1x1x2x128xf32>
    %421 = vector.shape_cast %420 : vector<1x1x2x128xf32> to vector<1x2x128xf32>
    %422 = vector.broadcast %419 : f32 to vector<1x2x128xf32>
    %423 = arith.mulf %422, %421 : vector<1x2x128xf32>
    %424 = arith.addf %418, %423 : vector<1x2x128xf32>
    %c7_143 = arith.constant 7 : index
    %c1_144 = arith.constant 1 : index
    %425 = memref.load %arg5[%c7_143, %c1_144] : memref<8x4xf32, #tpu.memory_space<smem>>
    %426 = vector.extract_strided_slice %1 {offsets = [0, 1, 0, 0], sizes = [1, 1, 2, 128], strides = [1, 1, 1, 1]} : vector<1x4x2x128xf32> to vector<1x1x2x128xf32>
    %427 = vector.shape_cast %426 : vector<1x1x2x128xf32> to vector<1x2x128xf32>
    %428 = vector.broadcast %425 : f32 to vector<1x2x128xf32>
    %429 = arith.mulf %428, %427 : vector<1x2x128xf32>
    %430 = arith.addf %424, %429 : vector<1x2x128xf32>
    %c7_145 = arith.constant 7 : index
    %c2_146 = arith.constant 2 : index
    %431 = memref.load %arg5[%c7_145, %c2_146] : memref<8x4xf32, #tpu.memory_space<smem>>
    %432 = vector.extract_strided_slice %1 {offsets = [0, 2, 0, 0], sizes = [1, 1, 2, 128], strides = [1, 1, 1, 1]} : vector<1x4x2x128xf32> to vector<1x1x2x128xf32>
    %433 = vector.shape_cast %432 : vector<1x1x2x128xf32> to vector<1x2x128xf32>
    %434 = vector.broadcast %431 : f32 to vector<1x2x128xf32>
    %435 = arith.mulf %434, %433 : vector<1x2x128xf32>
    %436 = arith.addf %430, %435 : vector<1x2x128xf32>
    %c7_147 = arith.constant 7 : index
    %c3_148 = arith.constant 3 : index
    %437 = memref.load %arg5[%c7_147, %c3_148] : memref<8x4xf32, #tpu.memory_space<smem>>
    %438 = vector.extract_strided_slice %1 {offsets = [0, 3, 0, 0], sizes = [1, 1, 2, 128], strides = [1, 1, 1, 1]} : vector<1x4x2x128xf32> to vector<1x1x2x128xf32>
    %439 = vector.shape_cast %438 : vector<1x1x2x128xf32> to vector<1x2x128xf32>
    %440 = vector.broadcast %437 : f32 to vector<1x2x128xf32>
    %441 = arith.mulf %440, %439 : vector<1x2x128xf32>
    %442 = arith.addf %436, %441 : vector<1x2x128xf32>
    %c7_149 = arith.constant 7 : index
    %443 = memref.load %arg7[%c7_149] : memref<8xf32, #tpu.memory_space<smem>>
    %cst_150 = arith.constant 0.000000e+00 : f32
    %444 = vector.broadcast %cst_150 : f32 to vector<1x2x128xf32>
    %445 = arith.maximumf %442, %444 : vector<1x2x128xf32>
    %446 = vector.broadcast %443 : f32 to vector<1x2x128xf32>
    %447 = arith.mulf %446, %445 : vector<1x2x128xf32>
    %448 = arith.addf %392, %447 : vector<1x2x128xf32>
    %c0_151 = arith.constant 0 : index
    %449 = memref.load %arg8[%c0_151] : memref<1xf32, #tpu.memory_space<smem>>
    %450 = vector.broadcast %449 : f32 to vector<1x2x128xf32>
    %451 = arith.addf %448, %450 : vector<1x2x128xf32>
    %cst_152 = arith.constant -3.000000e+01 : f32
    %cst_153 = arith.constant 3.000000e+01 : f32
    %452 = vector.broadcast %cst_152 : f32 to vector<1x2x128xf32>
    %453 = arith.maximumf %452, %451 : vector<1x2x128xf32>
    %454 = vector.broadcast %cst_153 : f32 to vector<1x2x128xf32>
    %455 = arith.minimumf %454, %453 : vector<1x2x128xf32>
    %cst_154 = arith.constant 0.000000e+00 : f32
    %456 = vector.broadcast %cst_154 : f32 to vector<1x2x128xf32>
    %457 = arith.subf %456, %455 : vector<1x2x128xf32>
    %458 = math.exp %457 : vector<1x2x128xf32>
    %cst_155 = arith.constant 1.000000e+00 : f32
    %459 = vector.broadcast %cst_155 : f32 to vector<1x2x128xf32>
    %460 = arith.addf %459, %458 : vector<1x2x128xf32>
    %461 = tpu.reciprocal %460 {approx = true} : vector<1x2x128xf32> -> vector<1x2x128xf32>
    %462 = arith.mulf %460, %461 : vector<1x2x128xf32>
    %cst_156 = arith.constant 2.000000e+00 : f32
    %463 = vector.broadcast %cst_156 : f32 to vector<1x2x128xf32>
    %464 = arith.subf %463, %462 : vector<1x2x128xf32>
    %465 = arith.mulf %461, %464 : vector<1x2x128xf32>
    %466 = vector.shape_cast %465 : vector<1x2x128xf32> to vector<1x1x2x128xf32>
    %467 = vector.broadcast %466 : vector<1x1x2x128xf32> to vector<1x4x2x128xf32>
    %468 = arith.mulf %1, %467 : vector<1x4x2x128xf32>
    %c0_157 = arith.constant 0 : index
    %c0_158 = arith.constant 0 : index
    %c0_159 = arith.constant 0 : index
    %c0_160 = arith.constant 0 : index
    %469 = vector.load %arg9[%c0_157, %c0_158, %c0_159, %c0_160] : memref<1x4x2x128xf32, #tpu.memory_space<vmem>>, vector<1x4x2x128xf32>
    tpu.vector_store %arg9[%c0_157, %c0_158, %c0_159, %c0_160], %468 {strides = array<i32>} : memref<1x4x2x128xf32, #tpu.memory_space<vmem>>, vector<1x4x2x128xf32>,
    return
  }
  func.func @transform_0(%arg0: i32, %arg1: i32) -> (i32, i32, i32, i32) {
    %c0_i32 = arith.constant 0 : i32
    %c0_i32_0 = arith.constant 0 : i32
    %c0_i32_1 = arith.constant 0 : i32
    return %arg0, %c0_i32, %arg1, %c0_i32_0 : i32, i32, i32, i32
  }
  func.func @transform_1(%arg0: i32, %arg1: i32) -> (i32, i32, i32, i32) {
    %c0_i32 = arith.constant 0 : i32
    %c0_i32_0 = arith.constant 0 : i32
    %c0_i32_1 = arith.constant 0 : i32
    return %arg0, %c0_i32, %arg1, %c0_i32_0 : i32, i32, i32, i32
  }
  func.func @transform_2(%arg0: i32, %arg1: i32) -> (i32, i32) {
    %c0_i32 = arith.constant 0 : i32
    %c0_i32_0 = arith.constant 0 : i32
    %c0_i32_1 = arith.constant 0 : i32
    return %c0_i32, %c0_i32_0 : i32, i32
  }
  func.func @transform_3(%arg0: i32, %arg1: i32) -> (i32, i32) {
    %c0_i32 = arith.constant 0 : i32
    %c0_i32_0 = arith.constant 0 : i32
    %c0_i32_1 = arith.constant 0 : i32
    return %c0_i32, %c0_i32_0 : i32, i32
  }
  func.func @transform_4(%arg0: i32, %arg1: i32) -> i32 {
    %c0_i32 = arith.constant 0 : i32
    %c0_i32_0 = arith.constant 0 : i32
    return %c0_i32 : i32
  }
  func.func @transform_5(%arg0: i32, %arg1: i32) -> i32 {
    %c0_i32 = arith.constant 0 : i32
    %c0_i32_0 = arith.constant 0 : i32
    return %c0_i32 : i32
  }
  func.func @transform_6(%arg0: i32, %arg1: i32) -> i32 {
    %c0_i32 = arith.constant 0 : i32
    %c0_i32_0 = arith.constant 0 : i32
    return %c0_i32 : i32
  }
  func.func @transform_7(%arg0: i32, %arg1: i32) -> (i32, i32, i32, i32) {
    %c0_i32 = arith.constant 0 : i32
    %c0_i32_0 = arith.constant 0 : i32
    %c0_i32_1 = arith.constant 0 : i32
    return %arg0, %c0_i32, %arg1, %c0_i32_0 : i32, i32, i32, i32
  }
}

</mosaic_0001>

<bundles_post_ra>
// kernel: tpu_custom_call.1
= control target key start
LH: loop header
LB: loop body
LE: loop exit
PB: predicated region body
PF: predicated region fallthrough
CT: control target
= control target key end

     0   :  { %s1882_s0 = inlined_call_operand.vmem [shape: f32[2,4,2,128], index: 0, kind: input, shape index: {}]   ;;  %s1883_s1 = inlined_call_operand.hbm [shape: f32[2,4,2,128], index: 1, kind: input, shape index: {}]   ;;  %s1884_s2 = inlined_call_operand.vmem [shape: f32[8,4], index: 2, kind: input, shape index: {}]   ;;  %s1885_s3 = inlined_call_operand.vmem [shape: f32[8,4], index: 3, kind: input, shape index: {}]   ;;  %s1886_s4 = inlined_call_operand.vmem [shape: f32[8], index: 4, kind: input, shape index: {}]   ;;  %s1887_s5 = inlined_call_operand.vmem [shape: f32[8], index: 5, kind: input, shape index: {}]   ;;  %s1888_s6 = inlined_call_operand.<no memory space> [shape: f32[1], index: 6, kind: input, shape index: {}]   ;;  %s1889_s7 = inlined_call_operand.hbm [shape: f32[2,4,2,128], index: 7, kind: output, shape index: {}]  }
   0x1   :  { %1899 = sst [smem:[#allocation24_spill]] %s1882_s0 }
   0x2   :  { %1900 = sst [smem:[#allocation25_spill]] %s1883_s1 }
   0x3   :  { %1901 = sst [smem:[#allocation26_spill]] %s1884_s2 }
   0x4   :  { %1902 = sst [smem:[#allocation27_spill]] %s1885_s3 }
   0x5   :  { %1903 = sst [smem:[#allocation28_spill]] %s1886_s4 }
   0x6   :  { %1904 = sst [smem:[#allocation29_spill]] %s1887_s5 }
   0x7   :  { %12 = sst [smem:[#allocation2]] %s1888_s6 }
   0x8   :  { %13 = vsyncpa [#allocation4], 0 }
   0x9   :  { %15 = vsyncpa [#allocation4 + $0x1], 0 }
   0xa   :  { %16 = vsyncpa [#allocation6], 0 }
   0xb   :  { %17 = vsyncpa [#allocation9], 0 }
   0xc   :  { %18 = vsyncpa [#allocation12], 0 }
   0xd   :  { %19 = vsyncpa [#allocation5], 0 }
   0xe   :  { %21 = vsyncpa [#allocation5 + $0x1], 0  ;;  %s1348_s26 = smov 0   ;;  %s1350_s27 = smov 0  }
   0xf   :  { %s1352_s28 = smov 0   ;;  %s1354_s29 = smov 0  }
  0x10   :  { %s1356_s30 = smov 0   ;;  %s1358_s8 = smov 0  }
  0x11 LB: > { %1905 = sst [smem:[#allocation19_spill]] %s1277_s27  ;;  %s897_s6 = sadd.s32 4294967295, %s1293_s8   ;;  %s1293_s8 = sphi %s1358_s8, %s27_s8   ;;  %s1289_s30 = sphi %s1356_s30, %s1935_s30   ;;  %s1285_s29 = sphi %s1354_s29, %s1934_s29   ;;  %s1281_s28 = sphi %s1352_s28, %s1933_s28   ;;  %s1277_s27 = sphi %s1350_s27, %s1932_s27   ;;  %s1273_s26 = sphi %s1348_s26, %s1931_s26  }
  0x12   : > { %1906 = sst [smem:[#allocation20_spill]] %s1281_s28  ;;  %s898_s9 = sadd.s32 4294967294, %s1293_s8  }
  0x13   : > { %1907 = sst [smem:[#allocation21_spill]] %s1289_s30  ;;  %p89_p0 = scmp.ne.s32.totalorder %s1277_s27, %s1273_s26 }
  0x14   : > { %p1382_p1 = scmp.eq.s32.totalorder %s897_s6, 0  ;;  %p1386_p2 = scmp.eq.s32.totalorder %s897_s6, 1 }
  0x15   : > { %p226_p3 = scmp.eq.s32.totalorder %s898_s9, 1  ;;  %p899_p5 = scmp.ge.s32.totalorder %s1293_s8, 1 }
  0x16   : > { %s1908_s10 = scalar_select %p1382_p1, 1, 0 }
  0x17   : > { %s1909_s11 = scalar_select %p1386_p2, 1, 0 }
  0x18   : > { %p1392_p4 = por %p1382_p1, %p89_p0  ;;  %p1397_p6 = por %p226_p3, %p89_p0 }
  0x19   : > { %p233_p7 = scmp.lt.s32.totalorder %s1293_s8, 3  ;;  %s1912_s3 = sld [smem:[#allocation27_spill]] }
  0x1a   : > { %s1910_s12 = scalar_select %p1392_p4, 1, 0 }
  0x1b   : > { %s1911_s13 = scalar_select %p1397_p6, 1, 0 }
  0x1c   : > { %p1405_p8 = pnand %p899_p5, %p233_p7  ;;  %s1914_s2 = sld [smem:[#allocation26_spill]] }
  0x1d   : > { %s1916_s4 = sld [smem:[#allocation28_spill]] }
  0x1e   : > { %s1913_s17 = scalar_select %p1405_p8, 1, 0 }
  0x1f   : > { %s257_s16 = sshll.u32 %s1912_s3, 4  ;;  %p1022_p10 = pneg %p1405_p8  ;;  %s258_s16 = int_to_ptr.vmem [resolvable:$true] %s257_s16 }
  0x20   : > { %s1113_s25 = scalar_lea.vmem %s258_s16, 128  ;;  %p1121_p5 = scmp.lt.s32.totalorder %s258_s16, %s258_s16 }
  0x21   : > { %p1417_p11 = pnand %p1022_p10, %p1382_p1  ;;  %p1114_p12 = scmp.ne.s32.totalorder %s258_s16, %s1113_s25 }
  0x22   : > { %s246_s20 = sshll.u32 %s1914_s2, 4  ;;  %p1122_p7 = scmp.lt.s32.totalorder %s1113_s25, %s1113_s25  ;;  %s247_s20 = int_to_ptr.vmem [resolvable:$true] %s246_s20 }
  0x23   : > { %s268_s24 = sshll.u32 %s1916_s4, 4  ;;  %p1115_p13 = pneg %p1417_p11  ;;  %s1424_s24 = int_to_ptr.vmem [resolvable:$true] %s268_s24 }
  0x24   : > { %p1123_p10 = por %p1122_p7, %p1121_p5 }
  0x25   : > { %p1116_p0 = pnand %p1115_p13, %p1114_p12 }
  0x27   : > { %p1117_p3 = pneg %p1116_p0 }
  0x29   : > { %p1124_p9 = pnand %p1123_p10, %p1117_p3 }
  0x2b   : > { %1127 = shalt.err (!%p1124_p9)
}
  0x2c   : > { %s1295_s6 = smov [#allocation8]   ;;  %s1128_s9 = scalar_lea.vmem %s247_s20, 128 }
  0x2d   : > { %1028 = dma.vmem_to_smem (!%p1417_p11), %s258_s16, 128, %s1295_s6, [#allocation9]  }
  0x2e   : > { %p1129_p6 = scmp.ne.s32.totalorder %s247_s20, %s1128_s9  ;;  %p1136_p8 = scmp.lt.s32.totalorder %s247_s20, %s247_s20 }
  0x2f   : > { %p1137_p2 = scmp.lt.s32.totalorder %s1128_s9, %s1128_s9 }
  0x30   : > { %p1131_p1 = pnand %p1129_p6, %p1115_p13 }
  0x31   : > { %p1138_p12 = por %p1137_p2, %p1136_p8 }
  0x32   : > { %p1132_p4 = pneg %p1131_p1 }
  0x34   : > { %p1139_p0 = pnand %p1138_p12, %p1132_p4 }
  0x36   : > { %1142 = shalt.err (!%p1139_p0)
}
  0x37   : > { %s1296_s14 = smov [#allocation7]   ;;  %s1917_s5 = sld [smem:[#allocation29_spill]] }
  0x38   : > { %1025 = dma.vmem_to_smem (!%p1417_p11), %s247_s20, 128, %s1296_s14, [#allocation6]  }
  0x39   : > { %s1143_s19 = scalar_lea.vmem %s1424_s24, 16  ;;  %p1151_p4 = scmp.lt.s32.totalorder %s1424_s24, %s1424_s24 }
  0x3a   : > { %p1144_p6 = scmp.ne.s32.totalorder %s1424_s24, %s1143_s19  ;;  %p1152_p8 = scmp.lt.s32.totalorder %s1143_s19, %s1143_s19 }
  0x3c   : > { %p1146_p1 = pnand %p1144_p6, %p1115_p13  ;;  %p1153_p9 = por %p1152_p8, %p1151_p4 }
  0x3d   : > { %s279_s18 = sshll.u32 %s1917_s5, 4  ;;  %s280_s18 = int_to_ptr.vmem [resolvable:$true] %s279_s18 }
  0x3e   : > { %p1147_p2 = pneg %p1146_p1 }
  0x40   : > { %p1154_p3 = pnand %p1153_p9, %p1147_p2 }
  0x42   : > { %1157 = shalt.err (!%p1154_p3)
}
  0x43   : > { %s1297_s22 = smov [#allocation10]   ;;  %s1158_s20 = scalar_lea.vmem %s280_s18, 16 }
  0x44   : > { %1031 = dma.vmem_to_smem (!%p1417_p11), %s1424_s24, 16, %s1297_s22, [#allocation9]  }
  0x45   : > { %p1159_p5 = scmp.ne.s32.totalorder %s280_s18, %s1158_s20  ;;  %p1166_p12 = scmp.lt.s32.totalorder %s280_s18, %s280_s18 }
  0x46   : > { %p1167_p0 = scmp.lt.s32.totalorder %s1158_s20, %s1158_s20 }
  0x47   : > { %p1161_p7 = pnand %p1159_p5, %p1115_p13 }
  0x48   : > { %p1168_p6 = por %p1167_p0, %p1166_p12 }
  0x49   : > { %p1162_p10 = pneg %p1161_p7 }
  0x4b   : > { %p1169_p1 = pnand %p1168_p6, %p1162_p10 }
  0x4d   : > { %1172 = shalt.err (!%p1169_p1)
}
  0x4e   : > { %s1298_s23 = smov [#allocation11]   ;;  %s39_s24 = sadd.s32 1, %s1289_s30 }
  0x4f   : > { %1034 = dma.vmem_to_smem (!%p1417_p11), %s280_s18, 16, %s1298_s23, [#allocation12]  }
  0x50   : > { %s76_s25 = sadd.s32 1, %s1281_s28  ;;  %p41_p13 = scmp.ge.s32.totalorder %s39_s24, 2 }
  0x51   : > { %p83_p2 = scmp.ne.s32.totalorder %s1281_s28, %s1277_s27  ;;  %p84_p4 = scmp.eq.s32.totalorder %s1293_s8, 0 }
  0x52   : > { %p1047_p8 = scmp.lt.s32.totalorder %s1293_s8, 2  ;;  %s1937_s24 = smov (%p41_p13, %s39_s24), 0 }
  0x53   : > { %1918 = sst [smem:[#allocation22_spill]] %s1937_s24  ;;  %p85_p9 = por %p84_p4, %p83_p2 }
  0x54   : > { %p1919_p3 = scmp.ne.s32.totalorder %s1909_s11, 0  ;;  %s71_s6 = ssub.s32 %s1289_s30, %s1937_s24 }
  0x55   : > { %s304_s9 = sand.u32 1, %s1281_s28   ;;  %p74_p7 = scmp.eq.s32.totalorder %s71_s6, 0 }
  0x56   : > { %p1466_p5 = por %p1919_p3, %p83_p2  ;;  %s905_s14 = sshll.u32 %s304_s9, 3 }
  0x57   : > { %s999_s15 = sshll.u32 %s1289_s30, 7  ;;  %s1922_s1 = sld [smem:[#allocation25_spill]] }
  0x58   : > { %s1475_s16 = scalar_select %p74_p7, %s1281_s28, %s76_s25  }
  0x59   : > { %s308_s20 = scalar_lea.vmem [#allocation3], %s905_s14  ;;  %p1482_p11 = pnand %p1047_p8, %p85_p9 }
  0x5a   : > { %1921 = sst [smem:[#allocation23_spill]] %s1475_s16  ;;  %s316_s23 = sshll.u32 %s308_s20, 4  ;;  %s317_s23 = int_to_ptr.vmem [resolvable:$true] %s316_s23 }
  0x5b   : > { %s305_s2 = scalar_lea.sflag [#allocation4], %s304_s9  ;;  %p1175_p10 = pneg %p1482_p11 }
  0x5c   : > { %s1186_s6 = scalar_lea.vmem %s317_s23, 128  ;;  %s1299_s25 = smov [#allocation3]  }
  0x5d   : > { %s315_s22 = scalar_lea.hbm %s1922_s1, %s999_s15  ;;  %p1187_p12 = scmp.ne.s32.totalorder %s317_s23, %s1186_s6 }
  0x5e   : > { %s1191_s3 = sshll.u32 %s1299_s25, 4  ;;  %s1192_s3 = int_to_ptr.vmem [resolvable:$false] %s1191_s3 }
  0x5f   : > { %p1189_p0 = pnand %p1187_p12, %p1175_p10  ;;  %s1193_s15 = scalar_lea.vmem %s1192_s3, 256 }
  0x60   : > { %p1194_p1 = scmp.lt.s32.totalorder %s317_s23, %s1192_s3  ;;  %p1195_p13 = scmp.lt.s32.totalorder %s1193_s15, %s1186_s6 }
  0x61   : > { %p1190_p6 = pneg %p1189_p0 }
  0x62   : > { %p1196_p2 = por %p1195_p13, %p1194_p1 }
  0x64   : > { %p1197_p4 = pnand %p1196_p2, %p1190_p6 }
  0x66   : > { %1200 = shalt.err (!%p1197_p4)
}
  0x67   : > { %s1300_s14 = smov 32   ;;  %s1301_s18 = smov 2  }
  0x68   : > { %1038 = dma.hbm_to_vmem [thread:$0]  (!%p1482_p11), %s315_s22, 128, %s317_s23, %s305_s2, %s1300_s14, %s1300_s14, %s1301_s18  }
  0x69   : > { %p1924_p8 = scmp.ne.s32.totalorder %s1913_s17, 0 }
  0x6a   : > { %s1493_s9 = sand.u32 (!%p1924_p8), 1, %s1277_s27   ;;  %p1925_p9 = scmp.ne.s32.totalorder (!%p1924_p8), %s1910_s12, 0 }
  0x6b   : > { %328 = sbr.rel (%p1924_p8) target bundleno = 285 (0x11d), region = 48  ;;  %s1894_s3 = sshll.u32 (!%p1924_p8), %s1493_s9, 3 }
  0x6c   : > { %s331_s19 = scalar_lea.sflag (!%p1924_p8), [#allocation4], %s1493_s9  ;;  %s1499_s20 = scalar_lea.vmem (!%p1924_p8), [#allocation3], %s1894_s3 }
  0x70   : > { %1252 = dma.done.wait (%p1925_p9), %s331_s19, 128  }
  0x71   : > { %1254 = vsyncadd (%p1925_p9), %s331_s19, 4294967168  ;;  %p1926_p3 = scmp.ne.s32.totalorder %s1908_s10, 0 }
  0x73   : > { %1256 = dma.done.wait (%p1926_p3), [#allocation6], 128  }
  0x74   : > { %1258 = vsyncadd (%p1926_p3), [#allocation6], 4294967168 }
  0x75   : > { %1260 = dma.done.wait (%p1926_p3), [#allocation9], 144  }
  0x76   : > { %1262 = vsyncadd (%p1926_p3), [#allocation9], 4294967152 }
  0x77   : > { %1264 = dma.done.wait (%p1926_p3), [#allocation12], 16  }
  0x78   : > { %1266 = vsyncadd (%p1926_p3), [#allocation12], 4294967280 }
  0x79   : > { %355 = sfence }
  0x7a   : > { %p390_p7 = scmp.lt.s32.totalorder %s1285_s29, 1  ;;  %s406_s2 = sld [smem:[#allocation7]]  ;;  %v1586_v21 = vld [vmem:[%s1499_s20] sm:$0x3]  ;;  %v1602_v31 = vld [vmem:[%s1499_s20 + $0x2] sm:$0x3] }
  0x7b   : > { %s409_s17 = sld [smem:[#allocation10]]  ;;  %v1620_v43 = vld [vmem:[%s1499_s20 + $0x4] sm:$0x3]  ;;  %v1645_v60 = vld [vmem:[%s1499_s20 + $0x6] sm:$0x3] }
  0x7c   : > { %s391_s12 = scalar_select %p390_p7, %s1285_s29, 1 }
  0x7d   : > { %s917_s22 = sld [smem:[#allocation7 + $0x1]] }
  0x7e   : > { %s1519_s23 = sld [smem:[#allocation7 + $0x2]]  ;;  %s1000_s25 = sshll.u32 %s391_s12, 3 }
  0x7f   : > { %s1521_s11 = sld [smem:[#allocation7 + $0x3]] }
  0x80   : > { %s1523_s6 = sld [smem:[#allocation8]]  ;;  %v407_v1 = vstv %s406_s2 }
  0x81   : > { %s1525_s15 = sld [smem:[#allocation8 + $0x1]]  ;;  %v410_v4 = vstv %s409_s17 }
  0x82   : > { %s1527_s14 = sld [smem:[#allocation8 + $0x2]] }
  0x83   : > { %s1529_s10 = sld [smem:[#allocation8 + $0x3]]  ;;  %v413_v5 = vstv %s917_s22 }
  0x84   : > { %s1927_s0 = sld [smem:[#allocation24_spill]]  ;;  %v417_v9 = vstv %s1519_s23 }
  0x85   : > { %s1534_s1 = sld [smem:[#allocation11]]  ;;  %v421_v14 = vstv %s1521_s11 }
  0x86   : > { %s923_s4 = sld [smem:[#allocation7 + $0x80]]  ;;  %v425_v22 = vstv %s1523_s6 }
  0x87   : > { %s1536_s5 = sld [smem:[#allocation10 + $0x1]]  ;;  %v426_v30 = vmul.f32 %v425_v22, %v1586_v21  ;;  %v429_v32 = vstv %s1525_s15 }
  0x88   : > { %s1540_s12 = sld [smem:[#allocation7 + $0x81]]  ;;  %v430_v40 = vmul.f32 %v429_v32, %v1602_v31  ;;  %v433_v41 = vstv %s1527_s14 }
  0x89   : > { %s1542_s24 = sld [smem:[#allocation7 + $0x82]]  ;;  %v434_v53 = vmul.f32 %v433_v41, %v1620_v43  ;;  %v437_v56 = vstv %s1529_s10 }
  0x8a   : > { %s397_s3 = scalar_lea.vmem %s1927_s0, %s1000_s25  ;;  %s1544_s30 = sld [smem:[#allocation7 + $0x83]] }
  0x8b   : > { %v1538_v0 = vld [vmem:[%s397_s3] sm:$0x3]  ;;  %s1547_s16 = sld [smem:[#allocation8 + $0x80]]  ;;  %v1549_v3 = vld [vmem:[%s397_s3 + $0x2] sm:$0x3] }
  0x8c   : > { %v408_v2 = vmul.f32 %v407_v1, %v1538_v0  ;;  %s1551_s25 = sld [smem:[#allocation8 + $0x81]]  ;;  %v414_v7 = vmul.f32 %v413_v5, %v1549_v3  ;;  %v1558_v8 = vld [vmem:[%s397_s3 + $0x4] sm:$0x3]  ;;  %v445_v10 = vstv %s923_s4  ;;  %v1570_v13 = vld [vmem:[%s397_s3 + $0x6] sm:$0x3] }
  0x8d   : > { %s1553_s18 = sld [smem:[#allocation8 + $0x82]]  ;;  %v418_v12 = vmul.f32 %v417_v9, %v1558_v8  ;;  %v446_v15 = vmul.f32 %v445_v10, %v1538_v0  ;;  %v448_v16 = vstv %s1536_s5  ;;  %v422_v20 = vmul.f32 %v421_v14, %v1570_v13 }
  0x8e   : > { %s1555_s2 = sld [smem:[#allocation8 + $0x83]]  ;;  %v411_v6 = vadd.f32 %v410_v4, %v408_v2  ;;  %v451_v17 = vstv %s1540_s12 }
  0x8f   : > { %s933_s19 = sld [smem:[#allocation7 + $0x100]]  ;;  %v449_v23 = vadd.f32 %v448_v16, %v446_v15  ;;  %v452_v24 = vmul.f32 %v451_v17, %v1549_v3  ;;  %v455_v25 = vstv %s1542_s24 }
  0x90   : > { %s1561_s0 = sld [smem:[#allocation11 + $0x1]]  ;;  %v415_v11 = vadd.f32 %v414_v7, %v411_v6  ;;  %v456_v34 = vmul.f32 %v455_v25, %v1558_v8  ;;  %v459_v35 = vstv %s1544_s30  ;;  %v438_v7 = vmul.f32 %v437_v56, %v1645_v60 }
  0x91   : > { %s1563_s17 = sld [smem:[#allocation10 + $0x2]]  ;;  %v453_v33 = vadd.f32 %v452_v24, %v449_v23  ;;  %v460_v45 = vmul.f32 %v459_v35, %v1570_v13  ;;  %v463_v48 = vstv %s1547_s16 }
  0x92   : > { %s1565_s22 = sld [smem:[#allocation7 + $0x101]]  ;;  %v419_v19 = vadd.f32 %v418_v12, %v415_v11  ;;  %v464_v58 = vmul.f32 %v463_v48, %v1586_v21  ;;  %v467_v62 = vstv %s1551_s25 }
  0x93   : > { %s1568_s28 = sld [smem:[#allocation7 + $0x102]]  ;;  %v457_v44 = vadd.f32 %v456_v34, %v453_v33  ;;  %v471_v4 = vstv %s1553_s18  ;;  %v468_v10 = vmul.f32 %v467_v62, %v1602_v31 }
  0x94   : > { %s1574_s23 = sld [smem:[#allocation7 + $0x103]]  ;;  %v423_v29 = vadd.f32 %v422_v20, %v419_v19  ;;  %v472_v17 = vmul.f32 %v471_v4, %v1620_v43  ;;  %v475_v22 = vstv %s1555_s2 }
  0x95   : > { %s1578_s4 = sld [smem:[#allocation8 + $0x100]]  ;;  %v484_v18 = vstv %s933_s19  ;;  %v461_v57 = vadd.f32 %v460_v45, %v457_v44 }
  0x96   : > { %s1580_s27 = sld [smem:[#allocation8 + $0x101]]  ;;  %v485_v26 = vmul.f32 %v484_v18, %v1538_v0  ;;  %v427_v39 = vadd.f32 %v426_v30, %v423_v29 }
  0x97   : > { %s1583_s3 = sld [smem:[#allocation8 + $0x102]]  ;;  %v487_v27 = vstv %s1563_s17  ;;  %v465_v9 = vadd.f32 %v464_v58, %v461_v57 }
  0x98   : > { %s1590_s5 = sld [smem:[#allocation8 + $0x103]]  ;;  %v490_v28 = vstv %s1565_s22  ;;  %v488_v36 = vadd.f32 %v487_v27, %v485_v26  ;;  %v431_v61 = vadd.f32 %v430_v40, %v427_v39 }
  0x99   : > { %s943_s11 = sld [smem:[#allocation7 + $0x180]]  ;;  %v491_v37 = vmul.f32 %v490_v28, %v1549_v3  ;;  %v494_v38 = vstv %s1568_s28  ;;  %v469_v26 = vadd.f32 %v468_v10, %v465_v9 }
  0x9a   : > { %s1596_s12 = sld [smem:[#allocation10 + $0x3]]  ;;  %v495_v50 = vmul.f32 %v494_v38, %v1558_v8  ;;  %v498_v52 = vstv %s1574_s23  ;;  %v435_v12 = vadd.f32 %v434_v53, %v431_v61 }
  0x9b   : > { %s1599_s6 = sld [smem:[#allocation7 + $0x181]]  ;;  %v492_v49 = vadd.f32 %v491_v37, %v488_v36  ;;  %v499_v1 = vmul.f32 %v498_v52, %v1570_v13  ;;  %v502_v2 = vstv %s1578_s4 }
  0x9c   : > { %s1606_s24 = sld [smem:[#allocation7 + $0x182]]  ;;  %v503_v15 = vmul.f32 %v502_v2, %v1586_v21  ;;  %v506_v18 = vstv %s1580_s27  ;;  %v1684_v35 = vadd.f32 %v438_v7, %v435_v12 }
  0x9d   : > { %s1610_s19 = sld [smem:[#allocation11 + $0x2]]  ;;  %v496_v63 = vadd.f32 %v495_v50, %v492_v49  ;;  %v507_v32 = vmul.f32 %v506_v18, %v1602_v31  ;;  %v510_v36 = vstv %s1583_s3  ;;  %v442_v18 = vstv %s1534_s1 }
  0x9e   : > { %s1613_s17 = sld [smem:[#allocation7 + $0x183]]  ;;  %v511_v48 = vmul.f32 %v510_v36, %v1620_v43  ;;  %v441_v50 = vmax.f32 %v1684_v35, 0.0 }
  0x9f   : > { %v523_v42 = vstv %s943_s11  ;;  %s1617_s15 = sld [smem:[#allocation8 + $0x180]]  ;;  %v500_v14 = vadd.f32 %v499_v1, %v496_v63 }
  0xa0   : > { %v524_v46 = vmul.f32 %v523_v42, %v1538_v0  ;;  %v526_v47 = vstv %s1596_s12  ;;  %s1625_s28 = sld [smem:[#allocation8 + $0x181]]  ;;  %v476_v42 = vmul.f32 %v475_v22, %v1645_v60  ;;  %v480_v22 = vstv %s1561_s0 }
  0xa1   : > { %v529_v51 = vstv %s1599_s6  ;;  %s1630_s30 = sld [smem:[#allocation8 + $0x182]]  ;;  %v504_v30 = vadd.f32 %v503_v15, %v500_v14 }
  0xa2   : > { %s1633_s14 = sld [smem:[#allocation8 + $0x183]]  ;;  %v527_v54 = vadd.f32 %v526_v47, %v524_v46  ;;  %v530_v55 = vmul.f32 %v529_v51, %v1549_v3  ;;  %v533_v59 = vstv %s1606_s24  ;;  %v473_v46 = vadd.f32 %v472_v17, %v469_v26 }
  0xa3   : > { %s1637_s22 = sld [smem:[#allocation7 + $0x200]]  ;;  %v534_v6 = vmul.f32 %v533_v59, %v1558_v8  ;;  %v508_v47 = vadd.f32 %v507_v32, %v504_v30  ;;  %v514_v51 = vstv %s1590_s5  ;;  %v443_v30 = vmul.f32 %v442_v18, %v441_v50 }
  0xa4   : > { %s1642_s16 = sld [smem:[#allocation10 + $0x4]]  ;;  %v531_v5 = vadd.f32 %v530_v55, %v527_v54  ;;  %v537_v11 = vstv %s1613_s17  ;;  %v477_v62 = vadd.f32 %v476_v42, %v473_v46  ;;  %v515_v1 = vmul.f32 %v514_v51, %v1645_v60 }
  0xa5   : > { %s955_s23 = sld [smem:[#allocation7 + $0x201]]  ;;  %v538_v24 = vmul.f32 %v537_v11, %v1570_v13  ;;  %v541_v27 = vstv %s1617_s15  ;;  %v512_v63 = vadd.f32 %v511_v48, %v508_v47  ;;  %v519_v35 = vstv %s1610_s19 }
  0xa6   : > { %s1650_s11 = sld [smem:[#allocation7 + $0x202]]  ;;  %v535_v23 = vadd.f32 %v534_v6, %v531_v5  ;;  %v542_v40 = vmul.f32 %v541_v27, %v1586_v21  ;;  %v545_v41 = vstv %s1625_s28  ;;  %v479_v26 = vmax.f32 %v477_v62, 0.0 }
  0xa7   : > { %s1654_s10 = sld [smem:[#allocation7 + $0x203]]  ;;  %v546_v52 = vmul.f32 %v545_v41, %v1602_v31  ;;  %v549_v54 = vstv %s1630_s30  ;;  %v516_v27 = vadd.f32 %v515_v1, %v512_v63 }
  0xa8   : > { %s1659_s20 = sld [smem:[#allocation11 + $0x3]]  ;;  %v539_v39 = vadd.f32 %v538_v24, %v535_v23  ;;  %v550_v4 = vmul.f32 %v549_v54, %v1620_v43  ;;  %v553_v5 = vstv %s1633_s14 }
  0xa9   : > { %v562_v16 = vstv %s1637_s22  ;;  %s1663_s25 = sld [smem:[#allocation8 + $0x200]] }
  0xaa   : > { %v563_v19 = vmul.f32 %v562_v16, %v1538_v0  ;;  %v565_v20 = vstv %s1642_s16  ;;  %s1669_s18 = sld [smem:[#allocation8 + $0x201]]  ;;  %v543_v53 = vadd.f32 %v542_v40, %v539_v39 }
  0xab   : > { %v568_v25 = vstv %s955_s23  ;;  %s1673_s4 = sld [smem:[#allocation8 + $0x202]] }
  0xac   : > { %v566_v28 = vadd.f32 %v565_v20, %v563_v19  ;;  %v569_v29 = vmul.f32 %v568_v25, %v1549_v3  ;;  %s1677_s27 = sld [smem:[#allocation8 + $0x203]]  ;;  %v572_v33 = vstv %s1650_s11  ;;  %v547_v9 = vadd.f32 %v546_v52, %v543_v53 }
  0xad   : > { %v576_v34 = vstv %s1654_s10  ;;  %s1682_s2 = sld [smem:[#allocation7 + $0x280]]  ;;  %v573_v38 = vmul.f32 %v572_v33, %v1558_v8 }
  0xae   : > { %v570_v37 = vadd.f32 %v569_v29, %v566_v28  ;;  %s1688_s12 = sld [smem:[#allocation10 + $0x5]]  ;;  %v577_v45 = vmul.f32 %v576_v34, %v1570_v13  ;;  %v551_v28 = vadd.f32 %v550_v4, %v547_v9  ;;  %v554_v29 = vmul.f32 %v553_v5, %v1645_v60 }
  0xaf   : > { %s1692_s6 = sld [smem:[#allocation7 + $0x281]]  ;;  %v580_v49 = vstv %s1663_s25 }
  0xb0   : > { %v574_v44 = vadd.f32 %v573_v38, %v570_v37  ;;  %s1696_s3 = sld [smem:[#allocation7 + $0x282]]  ;;  %v584_v55 = vstv %s1669_s18  ;;  %v581_v58 = vmul.f32 %v580_v49, %v1586_v21  ;;  %v555_v46 = vadd.f32 %v554_v29, %v551_v28 }
  0xb1   : > { %s1700_s24 = sld [smem:[#allocation7 + $0x283]]  ;;  %v585_v10 = vmul.f32 %v584_v55, %v1602_v31  ;;  %v588_v19 = vstv %s1673_s4 }
  0xb2   : > { %s1705_s17 = sld [smem:[#allocation8 + $0x280]]  ;;  %v578_v57 = vadd.f32 %v577_v45, %v574_v44  ;;  %v589_v33 = vmul.f32 %v588_v19, %v1620_v43  ;;  %v592_v36 = vstv %s1677_s27  ;;  %v481_v44 = vmul.f32 %v480_v22, %v479_v26 }
  0xb3   : > { %v601_v56 = vstv %s1682_s2  ;;  %s1710_s15 = sld [smem:[#allocation8 + $0x281]]  ;;  %v518_v45 = vmax.f32 %v516_v27, 0.0  ;;  %v593_v49 = vmul.f32 %v592_v36, %v1645_v60 }
  0xb4   : > { %s1713_s28 = sld [smem:[#allocation11 + $0x4]]  ;;  %v602_v59 = vmul.f32 %v601_v56, %v1538_v0  ;;  %v604_v61 = vstv %s1688_s12  ;;  %v582_v14 = vadd.f32 %v581_v58, %v578_v57 }
  0xb5   : > { %v607_v2 = vstv %s1692_s6  ;;  %s1719_s5 = sld [smem:[#allocation8 + $0x282]]  ;;  %v520_v62 = vmul.f32 %v519_v35, %v518_v45 }
  0xb6   : > { %v605_v6 = vadd.f32 %v604_v61, %v602_v59  ;;  %v608_v7 = vmul.f32 %v607_v2, %v1549_v3  ;;  %s1724_s30 = sld [smem:[#allocation8 + $0x283]]  ;;  %v611_v11 = vstv %s1696_s3  ;;  %v586_v32 = vadd.f32 %v585_v10, %v582_v14 }
  0xb7   : > { %v615_v12 = vstv %s1700_s24  ;;  %s1729_s22 = sld [smem:[#allocation7 + $0x300]]  ;;  %v612_v16 = vmul.f32 %v611_v11, %v1558_v8  ;;  %v482_v61 = vadd.f32 %v481_v44, %v443_v30  ;;  %v557_v2 = vmax.f32 %v555_v46, 0.0 }
  0xb8   : > { %v609_v15 = vadd.f32 %v608_v7, %v605_v6  ;;  %v616_v17 = vmul.f32 %v615_v12, %v1570_v13  ;;  %s1733_s14 = sld [smem:[#allocation10 + $0x6]]  ;;  %v619_v20 = vstv %s1705_s17  ;;  %v590_v48 = vadd.f32 %v589_v33, %v586_v32 }
  0xb9   : > { %s1738_s16 = sld [smem:[#allocation7 + $0x301]]  ;;  %v620_v24 = vmul.f32 %v619_v20, %v1586_v21  ;;  %v623_v25 = vstv %s1710_s15  ;;  %v558_v11 = vstv %s1659_s20 }
  0xba   : > { %v613_v23 = vadd.f32 %v612_v16, %v609_v15  ;;  %s1743_s23 = sld [smem:[#allocation7 + $0x302]]  ;;  %v624_v37 = vmul.f32 %v623_v25, %v1602_v31  ;;  %v594_v6 = vadd.f32 %v593_v49, %v590_v48  ;;  %v521_v15 = vadd.f32 %v520_v62, %v482_v61 }
  0xbb   : > { %s1746_s1 = sld [smem:[#allocation7 + $0x303]]  ;;  %v627_v40 = vstv %s1719_s5  ;;  %v597_v16 = vstv %s1713_s28  ;;  %s1001_s5 = sshll.u32 %s1285_s29, 7 }
  0xbc   : > { %v617_v34 = vadd.f32 %v616_v17, %v613_v23  ;;  %s1749_s0 = sld [smem:[#allocation8 + $0x300]]  ;;  %v628_v53 = vmul.f32 %v627_v40, %v1620_v43  ;;  %v631_v56 = vstv %s1724_s30  ;;  %v596_v25 = vmax.f32 %v594_v6, 0.0  ;;  %s1928_s30 = sshll.u32 %s1493_s9, 3 }
  0xbd   : > { %v640_v38 = vstv %s1729_s22  ;;  %s1755_s11 = sld [smem:[#allocation8 + $0x301]]  ;;  %v632_v9 = vmul.f32 %v631_v56, %v1645_v60  ;;  %s389_s22 = scalar_lea.vmem [#allocation13], %s1928_s30 }
  0xbe   : > { %v621_v39 = vadd.f32 %v620_v24, %v617_v34  ;;  %v641_v41 = vmul.f32 %v640_v38, %v1538_v0  ;;  %v643_v42 = vstv %s1733_s14  ;;  %s1760_s10 = sld [smem:[#allocation8 + $0x302]]  ;;  %v559_v24 = vmul.f32 %v558_v11, %v557_v2  ;;  %s753_s14 = sshll.u32 %s389_s22, 4  ;;  %s1830_s14 = int_to_ptr.vmem [resolvable:$true] %s753_s14 }
  0xbf   : > { %v646_v47 = vstv %s1738_s16  ;;  %s1763_s19 = sld [smem:[#allocation8 + $0x303]]  ;;  %s739_s29 = scalar_lea.sflag [#allocation5], %s1493_s9 }
  0xc0   : > { %s1766_s25 = sld [smem:[#allocation11 + $0x5]]  ;;  %v644_v50 = vadd.f32 %v643_v42, %v641_v41  ;;  %v647_v51 = vmul.f32 %v646_v47, %v1549_v3  ;;  %v625_v52 = vadd.f32 %v624_v37, %v621_v39  ;;  %v650_v54 = vstv %s1743_s23 }
  0xc1   : > { %v654_v55 = vstv %s1746_s1  ;;  %s1772_s18 = sld [smem:[#allocation7 + $0x380]]  ;;  %v651_v58 = vmul.f32 %v650_v54, %v1558_v8  ;;  %v560_v38 = vadd.f32 %v559_v24, %v521_v15  ;;  %v598_v39 = vmul.f32 %v597_v16, %v596_v25  ;;  %s1828_s1 = scalar_lea.hbm %s1889_s7, %s1001_s5 }
  0xc2   : > { %v648_v57 = vadd.f32 %v647_v51, %v644_v50  ;;  %v655_v59 = vmul.f32 %v654_v55, %v1570_v13  ;;  %s1777_s4 = sld [smem:[#allocation10 + $0x7]]  ;;  %v658_v63 = vstv %s1749_s0  ;;  %v629_v7 = vadd.f32 %v628_v53, %v625_v52  ;;  %s1201_s0 = scalar_lea.vmem %s1830_s14, 128 }
  0xc3   : > { %v662_v1 = vstv %s1755_s11  ;;  %s1781_s27 = sld [smem:[#allocation7 + $0x381]]  ;;  %v659_v5 = vmul.f32 %v658_v63, %v1586_v21  ;;  %v599_v50 = vadd.f32 %v598_v39, %v560_v38  ;;  %p1202_p11 = scmp.ne.s32.totalorder %s1830_s14, %s1201_s0 }
  0xc4   : > { %v652_v4 = vadd.f32 %v651_v58, %v648_v57  ;;  %s1784_s2 = sld [smem:[#allocation7 + $0x382]]  ;;  %v666_v10 = vstv %s1760_s10  ;;  %v663_v14 = vmul.f32 %v662_v1, %v1602_v31  ;;  %v633_v26 = vadd.f32 %v632_v9, %v629_v7  ;;  %s1302_s11 = smov [#allocation13]  }
  0xc5   : > { %s987_s12 = sld [smem:[#allocation7 + $0x383]]  ;;  %v670_v17 = vstv %s1763_s19  ;;  %v667_v20 = vmul.f32 %v666_v10, %v1620_v43  ;;  %p1203_p10 = pnand %p1202_p11, %p1466_p5 }
  0xc6   : > { %v656_v12 = vadd.f32 %v655_v59, %v652_v4  ;;  %s1790_s6 = sld [smem:[#allocation8 + $0x380]]  ;;  %v671_v29 = vmul.f32 %v670_v17, %v1645_v60  ;;  %v635_v42 = vmax.f32 %v633_v26, 0.0  ;;  %v636_v46 = vstv %s1766_s25  ;;  %s1205_s10 = sshll.u32 %s1302_s11, 4  ;;  %s1206_s10 = int_to_ptr.vmem [resolvable:$false] %s1205_s10 }
  0xc7   : > { %v679_v18 = vstv %s1772_s18  ;;  %s1795_s3 = sld [smem:[#allocation8 + $0x381]]  ;;  %p1204_p12 = pneg %p1203_p10 }
  0xc8   : > { %v660_v19 = vadd.f32 %v659_v5, %v656_v12  ;;  %v680_v22 = vmul.f32 %v679_v18, %v1538_v0  ;;  %v682_v23 = vstv %s1777_s4  ;;  %s1800_s20 = sld [smem:[#allocation8 + $0x382]]  ;;  %s1207_s19 = scalar_lea.vmem %s1206_s10, 256 }
  0xc9   : > { %v685_v27 = vstv %s1781_s27  ;;  %s1803_s24 = sld [smem:[#allocation8 + $0x383]]  ;;  %p1208_p0 = scmp.lt.s32.totalorder %s1830_s14, %s1206_s10 }
  0xca   : > { %v664_v28 = vadd.f32 %v663_v14, %v660_v19  ;;  %v683_v30 = vadd.f32 %v682_v23, %v680_v22  ;;  %v686_v32 = vmul.f32 %v685_v27, %v1549_v3  ;;  %s1807_s17 = sld [smem:[#allocation11 + $0x6]]  ;;  %v689_v0 = vstv %s1784_s2  ;;  %p1209_p6 = scmp.lt.s32.totalorder %s1207_s19, %s1201_s0 }
  0xcb   : > { %v693_v33 = vstv %s987_s12  ;;  %v690_v36 = vmul.f32 %v689_v0, %v1558_v8  ;;  %s992_s15 = sld [smem:[#allocation11 + $0x7]]  ;;  %v637_v8 = vmul.f32 %v636_v46, %v635_v42 }
  0xcc   : > { %v668_v34 = vadd.f32 %v667_v20, %v664_v28  ;;  %v687_v35 = vadd.f32 %v686_v32, %v683_v30  ;;  %v694_v37 = vmul.f32 %v693_v33, %v1570_v13  ;;  %v697_v40 = vstv %s1790_s6  ;;  %s717_s28 = sld [smem:[#allocation2]]  ;;  %p1210_p1 = por %p1209_p6, %p1208_p0 }
  0xcd   : > { %v701_v41 = vstv %s1795_s3  ;;  %v698_v45 = vmul.f32 %v697_v40, %v1586_v21  ;;  %v638_v57 = vadd.f32 %v637_v8, %v599_v50 }
  0xce   : > { %v672_v3 = vadd.f32 %v671_v29, %v668_v34  ;;  %v691_v44 = vadd.f32 %v690_v36, %v687_v35  ;;  %v705_v47 = vstv %s1800_s20  ;;  %v702_v49 = vmul.f32 %v701_v41, %v1602_v31  ;;  %p1211_p13 = pnand %p1210_p1, %p1204_p12 }
  0xcf   : > { %v709_v51 = vstv %s1803_s24  ;;  %v706_v53 = vmul.f32 %v705_v47, %v1620_v43 }
  0xd0   : > { %v695_v48 = vadd.f32 %v694_v37, %v691_v44  ;;  %v674_v13 = vmax.f32 %v672_v3, 0.0  ;;  %v675_v54 = vstv %s1807_s17  ;;  %v710_v56 = vmul.f32 %v709_v51, %v1645_v60 }
  0xd1   : > { %v714_v62 = vstv %s992_s15 }
  0xd2   : > { %v699_v52 = vadd.f32 %v698_v45, %v695_v48  ;;  %v676_v58 = vmul.f32 %v675_v54, %v674_v13  ;;  %v718_v4 = vstv %s717_s28 }
  0xd4   : > { %v703_v55 = vadd.f32 %v702_v49, %v699_v52  ;;  %v677_v63 = vadd.f32 %v676_v58, %v638_v57 }
  0xd6   : > { %v707_v59 = vadd.f32 %v706_v53, %v703_v55 }
  0xd8   : > { %v711_v61 = vadd.f32 %v710_v56, %v707_v59 }
  0xda   : > { %v713_v1 = vmax.f32 %v711_v61, 0.0 }
  0xdc   : > { %v715_v2 = vmul.f32 %v714_v62, %v713_v1 }
  0xde   : > { %v716_v5 = vadd.f32 %v715_v2, %v677_v63 }
  0xe0   : > { %v719_v6 = vadd.f32 %v718_v4, %v716_v5 }
  0xe2   : > { %v993_v7 = vclamps-f32 %v719_v6, 30.0 }
  0xe4   : > { %v722_v9 = vsub.f32 0.0, %v993_v7 }
  0xe6   : > { %v723_v10 = vmul.f32 1.442695, %v722_v9 }
  0xe8   : > { %1109 = vpow2.f32 %v723_v10 }
  0xf5   : > { %v1110_v11 = vpop.eup %1109 }
  0xf6   : > { %v725_v12 = vadd.f32 1.0, %v1110_v11 }
  0xf8   : > { %1111 = vrcp.f32 %v725_v12 }
 0x105   : > { %v1112_v14 = vpop.eup %1111 }
 0x106   : > { %v727_v15 = vmul.f32 %v1112_v14, %v725_v12 }
 0x108   : > { %v728_v16 = vsub.f32 2.0, %v727_v15 }
 0x10a   : > { %v729_v17 = vmul.f32 %v1112_v14, %v728_v16 }
 0x10c   : > { %v730_v18 = vmul.f32 %v729_v17, %v1586_v21  ;;  %v731_v19 = vmul.f32 %v729_v17, %v1602_v31  ;;  %v732_v20 = vmul.f32 %v729_v17, %v1620_v43  ;;  %v733_v22 = vmul.f32 %v729_v17, %v1645_v60 }
 0x10e   : > { %734 = vst [vmem:[%s389_s22] sm:$0x3] %v730_v18  ;;  %735 = vst [vmem:[%s389_s22 + $0x2] sm:$0x3] %v731_v19 }
 0x10f   : > { %736 = vst [vmem:[%s389_s22 + $0x4] sm:$0x3] %v732_v20  ;;  %737 = vst [vmem:[%s389_s22 + $0x6] sm:$0x3] %v733_v22 }
 0x110   : > { %1214 = shalt.err (!%p1211_p13)
}
 0x111   : > { %s1215_s25 = scalar_lea.hbm %s1828_s1, 128  ;;  %s1219_s27 = scalar_lea.hbm %s1889_s7, 256 }
 0x112   : > { %p1216_p2 = scmp.ne.s32.totalorder %s1828_s1, %s1215_s25  ;;  %p1220_p9 = scmp.lt.s32.totalorder %s1828_s1, %s1889_s7 }
 0x113   : > { %p1221_p3 = scmp.lt.s32.totalorder %s1219_s27, %s1215_s25 }
 0x114   : > { %p1217_p4 = pnand %p1216_p2, %p1466_p5 }
 0x115   : > { %p1222_p7 = por %p1221_p3, %p1220_p9 }
 0x116   : > { %p1218_p8 = pneg %p1217_p4 }
 0x118   : > { %p1223_p11 = pnand %p1222_p7, %p1218_p8 }
 0x11a   : > { %1226 = shalt.err (!%p1223_p11)
}
 0x11b   : > { %s1303_s6 = smov 32   ;;  %s1304_s3 = smov 2  }
 0x11c   : > { %1020 = dma.vmem_to_hbm [thread:$0]  (%p1466_p5), %s1830_s14, 128, %s1828_s1, %s739_s29, %s1303_s6, %s1303_s6, %s1304_s3  }
 0x11d PF: > { %s768_s20 = sand.u32 1, %s1273_s26   ;;  %p1929_p10 = scmp.ne.s32.totalorder %s1911_s13, 0 }
 0x11e   : > { %p1930_p12 = scmp.ge.s32.totalorder %s1293_s8, 2  ;;  %s769_s24 = scalar_lea.sflag [#allocation5], %s768_s20 }
 0x120   : > { %p1040_p0 = pnand %p1930_p12, %p1929_p10 }
 0x122   : > { %p1041_p6 = pneg %p1040_p0 }
 0x124   : > { %1268 = dma.done.wait (%p1041_p6), %s769_s24, 128  }
 0x125   : > { %1270 = vsyncadd (%p1041_p6), %s769_s24, 4294967168  ;;  %s27_s8 = sadd.s32 1, %s1293_s8   ;;  %s1931_s26 = sld [smem:[#allocation19_spill]] }
 0x126   : > { %p24_p1 = scmp.ge.s32.totalorder %s27_s8, 4   ;;  %s1932_s27 = sld [smem:[#allocation20_spill]] }
 0x127   : > { %s1933_s28 = sld [smem:[#allocation23_spill]] }
 0x128   : > { %s1934_s29 = sld [smem:[#allocation21_spill]]  ;;  %26 = sbr.rel (!%p24_p1) target bundleno = 17 (0x11), region = 113 }
 0x129   : > { %s1935_s30 = sld [smem:[#allocation22_spill]] }
 0x12d   :  { %774 = vsyncpa [#allocation4], 1 }
 0x12e   :  { %776 = vsyncpa [#allocation4 + $0x1], 1 }
 0x12f   :  { %777 = vsyncpa [#allocation5], 1 }
 0x130   :  { %779 = vsyncpa [#allocation5 + $0x1], 1 }
 0x131   :  { %780 = vsyncpa [#allocation6], 1 }
 0x132   :  { %782 = vsyncpa [#allocation6 + $0x1], 1 }
 0x133   :  { %783 = vsyncpa [#allocation9], 1 }
 0x134   :  { %784 = vsyncpa [#allocation12], 1 }

</bundles_post_ra>
